<compile_context>
chip_gen: v5e
topology: v5e:2x2
jax: 0.10.0
libtpu: 0.0.40
codegen_flags: <defaults>
</compile_context>

<pallas_src>
import functools

import jax
import jax.numpy as jnp
from jax import lax
from jax.experimental import pallas as pl
from jax.experimental.pallas import tpu as pltpu


_LANES = 128          # per-tile stats are packed into one 128-lane f32 row
_NUM_STATS = 20       # 5 tensors x (sum, sumsq, max, min)


def _round_up(x, m):
    return ((x + m - 1) // m) * m


def _choose_tile_m(m_rows, n_cols):
    # Keep the ~6 live [TILE_M, N] f32 temporaries under ~12 MiB so the kernel
    # fits every generation's scoped VMEM (v7x is the tightest at 64 MiB
    # physical).  Prefer large tiles to amortise per-step overhead, but
    # guarantee >= 2 grid steps when the problem is big enough to benefit from
    # v7x's two TensorCores.  Tiles are multiples of 32 (int8/bf16 friendly).
    budget_rows = (12 * 1024 * 1024) // (max(n_cols, 1) * 4 * 6)
    tile_cap = int(min(256, max(32, (budget_rows // 32) * 32)))
    if m_rows <= 32:
        return _round_up(m_rows, 16)
    if m_rows <= 2 * tile_cap:
        # split into two tiles so both v7x TensorCores get work
        return min(tile_cap, _round_up((m_rows + 1) // 2, 32))
    return tile_cap


@functools.lru_cache(maxsize=None)
def _vmem_limit_bytes():
    # ~half the physical VMEM of the current chip: 64 MiB on v5e/v6e
    # (128 MiB physical), 32 MiB on v7x (64 MiB physical).
    try:
        cap = pltpu.get_tpu_info().vmem_capacity_bytes
    except Exception:  # query unavailable -> safe default for all gens
        cap = 64 * 1024 * 1024
    return int(max(32 * 1024 * 1024, min(cap // 2, 96 * 1024 * 1024)))


def _compiler_params():
    return pltpu.CompilerParams(
        # Each grid step owns its own output block -> the row-tile axis is
        # embarrassingly parallel (2x on v7x megacore, harmless on v5e/v6e).
        dimension_semantics=("parallel",),
        vmem_limit_bytes=_vmem_limit_bytes(),
    )


def _resident_spec(block_shape, index_map, single_buffer):
    # Blocks whose index_map is constant across the grid never change; a
    # single resident buffer halves their VMEM footprint.
    if single_buffer:
        return pl.BlockSpec(block_shape, index_map,
                            pipeline_mode=pl.Buffered(1))
    return pl.BlockSpec(block_shape, index_map)


def _pallas_partials(kernel, out_shape, grid, in_specs_fn, out_spec, args):
    # Prefer single-buffered resident blocks; fall back to default
    # double-buffering if this JAX/Mosaic version rejects pipeline_mode on a
    # top-level BlockSpec.
    last_err = None
    for single in (True, False):
        try:
            fn = pl.pallas_call(
                kernel,
                out_shape=out_shape,
                grid=grid,
                in_specs=in_specs_fn(single),
                out_specs=out_spec,
                compiler_params=_compiler_params(),
            )
            return fn(*args)
        except Exception as e:  # deliberate fallback, re-raised if both fail
            last_err = e
    raise last_err


def _anchor_dot_contrast(anchor_ref, contrast_ref):
    # anchor:   [TM, D_pad] bf16, 1/temperature already folded in (wrapper)
    # contrast: [D_pad, N]  bf16, pre-transposed in the wrapper so the MXU
    #           sees a plain NN contraction (no per-step RHS re-layout).
    return lax.dot_general(anchor_ref[...], contrast_ref[...],
                           dimension_numbers=(((1,), (0,)), ((), ())),
                           preferred_element_type=jnp.float32)


def _row_col_ids(tile_m, n, m_valid):
    i = pl.program_id(0)
    row_ids = i * tile_m + lax.broadcasted_iota(jnp.int32, (tile_m, 1), 0)
    col_ids = lax.broadcasted_iota(jnp.int32, (tile_m, n), 1)
    self_col = col_ids == row_ids          # GLOBAL row index per tile
    valid = row_ids < m_valid              # real (non-padded) anchor rows
    return self_col, valid


def _tile_stats(adc, pos_bool, self_col, valid, out_ref):
    """Reduce one [TILE_M, N] tile of the SupCon computation to 20 scalars.

    adc:      [TM, N] f32   anchor . contrast / temperature (pre max-shift)
    pos_bool: [TM, N] bool  positive-pair mask, self column already removed
    self_col: [TM, N] bool  True at the anchor's own contrast column
    valid:    [TM, 1] bool  True for real (non-padded) anchor rows
    out_ref:  (1, 1, 128) f32 output block (lane-dense store)
    """
    n = adc.shape[1]

    # ---- reference math, row-wise; nothing [M, N]-sized is ever stored ------
    logits_max = jnp.max(adc, axis=1, keepdims=True)
    logits = adc - logits_max                       # row max is exactly 0
    exp_all = jnp.exp(logits)                       # == torch.exp(logits)

    # exp_logits == exp_all with the self column zeroed; derive its stats
    # algebraically instead of materialising another [TM, N] temporary.
    exp_self = jnp.sum(jnp.where(self_col, exp_all, 0.0), axis=1, keepdims=True)
    rs_e = jnp.sum(exp_all, axis=1, keepdims=True)
    rss_e = jnp.sum(exp_all * exp_all, axis=1, keepdims=True)
    denom = rs_e - exp_self                          # == exp_logits.sum(1)
    rss_em = rss_e - exp_self * exp_self
    rmax_em = jnp.exp(jnp.max(jnp.where(self_col, -jnp.inf, logits),
                              axis=1, keepdims=True))
    log_denom = jnp.log(denom)

    # mean_log_prob_pos = sum(mask*log_prob)/sum(mask) without forming the
    # [M, N] log_prob matrix: sum_pos(logits) - cnt*log(denom).
    pos_cnt = jnp.sum(jnp.where(pos_bool, 1.0, 0.0), axis=1, keepdims=True)
    pos_logit_sum = jnp.sum(jnp.where(pos_bool, logits, 0.0),
                            axis=1, keepdims=True)
    # Anchors with zero positives are NaN in the reference; guard them to 0.
    mlpp = jnp.where(pos_cnt > 0.0,
                     (pos_logit_sum - pos_cnt * log_denom)
                     / jnp.maximum(pos_cnt, 1.0),
                     0.0)

    # ---- per-row reductions feeding the five stat groups --------------------
    rs_l = jnp.sum(logits, axis=1, keepdims=True)
    rss_l = jnp.sum(logits * logits, axis=1, keepdims=True)
    rmin_l = jnp.min(logits, axis=1, keepdims=True)
    rmin_e = jnp.exp(rmin_l)                         # exp is monotone
    # row max of logits is exactly 0 (max-shifted) -> row max of exp is 1.

    # log_prob = logits - log_denom, reduced algebraically (never materialised)
    n_f = jnp.float32(n)
    rs_lp = rs_l - n_f * log_denom
    rss_lp = rss_l - 2.0 * log_denom * rs_l + n_f * log_denom * log_denom
    rmax_lp = -log_denom                             # 0 - log_denom
    rmin_lp = rmin_l - log_denom

    # ---- mask padded rows and collapse to per-tile scalars -------------------
    def msum(x):
        return jnp.sum(jnp.where(valid, x, 0.0), keepdims=True)

    def mmax(x):
        return jnp.max(jnp.where(valid, x, -jnp.inf), keepdims=True)

    def mmin(x):
        return jnp.min(jnp.where(valid, x, jnp.inf), keepdims=True)

    vals = (
        # logits: sum, sumsq, max, min      (max is exactly 0 by construction)
        msum(rs_l), msum(rss_l), 0.0, mmin(rmin_l),
        # exp(logits)                       (max is exactly exp(0) = 1)
        msum(rs_e), msum(rss_e), 1.0, mmin(rmin_e),
        # exp_logits (self column zeroed)   (min is exactly 0: the self column)
        msum(denom), msum(rss_em), mmax(rmax_em), 0.0,
        # log_prob
        msum(rs_lp), msum(rss_lp), mmax(rmax_lp), mmin(rmin_lp),
        # mean_log_prob_pos (per anchor row)
        msum(mlpp), msum(mlpp * mlpp), mmax(mlpp), mmin(mlpp),
    )
    assert len(vals) == _NUM_STATS

    lane = lax.broadcasted_iota(jnp.int32, (1, 1, _LANES), 2)
    packed = jnp.zeros((1, 1, _LANES), jnp.float32)
    for k, v in enumerate(vals):
        packed = jnp.where(lane == k, v, packed)
    out_ref[...] = packed


def _supcon_labels_kernel(anchor_ref, contrast_ref, rlab_ref, clab_ref,
                          out_ref, *, m_valid):
    tile_m = anchor_ref.shape[0]
    n = contrast_ref.shape[1]                        # contrast is [D_pad, N]
    adc = _anchor_dot_contrast(anchor_ref, contrast_ref)
    self_col, valid = _row_col_ids(tile_m, n, m_valid)
    # positive mask built in-kernel from O(M+N) label vectors, kept boolean
    pos_bool = (rlab_ref[...] == clab_ref[...]) & jnp.logical_not(self_col)
    _tile_stats(adc, pos_bool, self_col, valid, out_ref)


def _supcon_mask_kernel(anchor_ref, contrast_ref, mask_ref, out_ref,
                        *, m_valid):
    tile_m = anchor_ref.shape[0]
    n = contrast_ref.shape[1]
    adc = _anchor_dot_contrast(anchor_ref, contrast_ref)
    self_col, valid = _row_col_ids(tile_m, n, m_valid)
    pos_bool = (mask_ref[...] != 0) & jnp.logical_not(self_col)
    _tile_stats(adc, pos_bool, self_col, valid, out_ref)


def _run_labels(anchor, contrast_t, row_labels, col_labels, m_valid, tile_m):
    m_pad, d_pad = anchor.shape
    n = contrast_t.shape[1]
    grid = (m_pad // tile_m,)
    kernel = functools.partial(_supcon_labels_kernel, m_valid=m_valid)
    out_shape = jax.ShapeDtypeStruct((grid[0], 1, _LANES), jnp.float32)
    out_spec = pl.BlockSpec((1, 1, _LANES), lambda i: (i, 0, 0))

    def in_specs(single_buffer):
        return [
            pl.BlockSpec((tile_m, d_pad), lambda i: (i, 0)),     # anchor rows
            _resident_spec((d_pad, n), lambda i: (0, 0),
                           single_buffer),                       # contrast^T
            pl.BlockSpec((tile_m, 1), lambda i: (i, 0)),         # row labels
            _resident_spec((1, n), lambda i: (0, 0),
                           single_buffer),                       # col labels
        ]

    return _pallas_partials(kernel, out_shape, grid, in_specs, out_spec,
                            (anchor, contrast_t, row_labels, col_labels))


def _run_mask(anchor, contrast_t, mask_tiled, m_valid, tile_m):
    m_pad, d_pad = anchor.shape
    n = contrast_t.shape[1]
    grid = (m_pad // tile_m,)
    kernel = functools.partial(_supcon_mask_kernel, m_valid=m_valid)
    out_shape = jax.ShapeDtypeStruct((grid[0], 1, _LANES), jnp.float32)
    out_spec = pl.BlockSpec((1, 1, _LANES), lambda i: (i, 0, 0))

    def in_specs(single_buffer):
        return [
            pl.BlockSpec((tile_m, d_pad), lambda i: (i, 0)),     # anchor rows
            _resident_spec((d_pad, n), lambda i: (0, 0),
                           single_buffer),                       # contrast^T
            pl.BlockSpec((tile_m, n), lambda i: (i, 0)),         # int8 mask
        ]

    return _pallas_partials(kernel, out_shape, grid, in_specs, out_spec,
                            (anchor, contrast_t, mask_tiled))


def _finalize(partials, m_valid, n, temperature, base_temperature):
    """Combine per-tile partial reductions into (loss, stats)."""
    p = partials.reshape(-1, _LANES).astype(jnp.float32)
    sums = jnp.sum(p, axis=0)
    maxes = jnp.max(p, axis=0)
    mins = jnp.min(p, axis=0)

    def group(k, count):
        s, ss = sums[4 * k], sums[4 * k + 1]
        mx, mn = maxes[4 * k + 2], mins[4 * k + 3]
        cnt = jnp.float32(count)
        mean = s / cnt
        # unbiased std, matching torch.Tensor.std() (raw-moment form; can lose
        # precision vs the reference's direct std for extreme logits)
        var = jnp.maximum(ss - cnt * mean * mean, 0.0) / jnp.maximum(cnt - 1.0,
                                                                     1.0)
        return (mean, jnp.sqrt(var), mx, mn)

    cnt_mat = m_valid * n
    stats = (group(0, cnt_mat),    # logits
             group(1, cnt_mat),    # exp(logits)
             group(2, cnt_mat),    # exp_logits
             group(3, cnt_mat),    # log_prob
             group(4, m_valid))    # mean_log_prob_pos

    mlpp_mean = sums[16] / jnp.float32(m_valid)
    loss = -(temperature / base_temperature) * mlpp_mean
    return loss, stats


def sup_con_loss(features, labels=None, mask=None, *, temperature=0.07,
                 contrast_mode='all', base_temperature=0.07):
    """JAX/Pallas SupConLoss.forward (Euclidean path, use_angles=False).

    Returns (loss, stats) where stats mirrors the reference: a 5-tuple of
    (mean, std, max, min) for logits, exp(logits), exp_logits, log_prob and
    mean_log_prob_pos.
    """
    # TODO(synk): the hyperbolic / poincare / use_angles branches (hyperbolic
    # pairwise distances) and the NaN-dump-to-disk/wandb debug path are not
    # implemented here.
    if features.ndim < 3:
        raise ValueError('`features` needs to be [bsz, n_views, ...],'
                         'at least 3 dimensions are required')
    if features.ndim > 3:
        features = features.reshape(features.shape[0], features.shape[1], -1)
    bsz, n_views, dim = features.shape

    if labels is not None and mask is not None:
        raise ValueError('Cannot define both `labels` and `mask`')

    contrast_count = n_views
    # torch.cat(torch.unbind(features, dim=1), dim=0): view-major row order.
    contrast_feature = jnp.transpose(features, (1, 0, 2)).reshape(
        bsz * n_views, dim)
    if contrast_mode == 'one':
        anchor_feature = features[:, 0]
        anchor_count = 1
    elif contrast_mode == 'all':
        anchor_feature = contrast_feature
        anchor_count = contrast_count
    else:
        raise ValueError('Unknown mode: {}'.format(contrast_mode))

    m = anchor_count * bsz            # anchor rows
    n = contrast_count * bsz          # contrast rows

    d_pad = _round_up(dim, _LANES)    # lane padding only; no K=256 padding
    tile_m = _choose_tile_m(m, n)
    m_pad = _round_up(m, tile_m)
    inv_temp = 1.0 / float(temperature)

    # 1/temperature is folded into the anchor here (one fused XLA elementwise
    # pass over data that is being padded/cast anyway), not per grid step.
    anchor = anchor_feature.astype(jnp.float32) * inv_temp
    anchor = jnp.pad(anchor, ((0, m_pad - m), (0, d_pad - dim)))
    anchor = anchor.astype(jnp.bfloat16)

    # Contrast is pre-transposed to [D_pad, N] so the in-kernel matmul is a
    # plain NN contraction (no per-step XLU re-layout of the resident RHS).
    contrast = contrast_feature.astype(jnp.float32)
    contrast = jnp.pad(contrast, ((0, 0), (0, d_pad - dim)))
    contrast_t = jnp.transpose(contrast).astype(jnp.bfloat16)

    if mask is None:
        # labels path (also covers the SimCLR default mask = eye(bsz)).
        if labels is None:
            labels_vec = jnp.arange(bsz, dtype=jnp.int32)
        else:
            labels_vec = jnp.asarray(labels).reshape(-1).astype(jnp.int32)
            if labels_vec.shape[0] != bsz:
                raise ValueError('Num of labels does not match num of features')
        row_labels = jnp.tile(labels_vec, anchor_count)
        col_labels = jnp.tile(labels_vec, contrast_count)
        row_labels = jnp.pad(row_labels, (0, m_pad - m),
                             constant_values=-1).reshape(m_pad, 1)
        col_labels = col_labels.reshape(1, n)
        partials = _run_labels(anchor, contrast_t, row_labels, col_labels,
                               m, tile_m)
    else:
        # Explicit user mask: tiled host-side and shipped as int8 (4x less HBM
        # traffic / VMEM than f32).
        # TODO(synk): non-binary (weighted) user masks are treated as boolean.
        mask_t = jnp.tile(jnp.asarray(mask) != 0,
                          (anchor_count, contrast_count))
        mask_t = jnp.pad(mask_t, ((0, m_pad - m), (0, 0))).astype(jnp.int8)
        partials = _run_mask(anchor, contrast_t, mask_t, m, tile_m)

    return _finalize(partials, m, n, temperature, base_temperature)


def _reference_loss(features, labels=None, mask=None, temperature=0.07,
                    contrast_mode='all', base_temperature=0.07):
    """Pure-JAX f32 reference mirroring the PyTorch module (loss only)."""
    bsz, n_views, dim = features.shape
    contrast = jnp.transpose(features, (1, 0, 2)).reshape(bsz * n_views, dim)
    if contrast_mode == 'all':
        anchor, anchor_count = contrast, n_views
    else:
        anchor, anchor_count = features[:, 0], 1
    if mask is None:
        if labels is None:
            base = jnp.eye(bsz, dtype=jnp.float32)
        else:
            lv = labels.reshape(-1, 1)
            base = (lv == lv.T).astype(jnp.float32)
    else:
        base = mask.astype(jnp.float32)
    full_mask = jnp.tile(base, (anchor_count, n_views))
    adc = (anchor @ contrast.T) / temperature
    logits = adc - jnp.max(adc, axis=1, keepdims=True)
    m_rows, n_cols = logits.shape
    logits_mask = 1.0 - jnp.eye(m_rows, n_cols, dtype=jnp.float32)
    full_mask = full_mask * logits_mask
    exp_logits = jnp.exp(logits) * logits_mask
    log_prob = logits - jnp.log(jnp.sum(exp_logits, axis=1, keepdims=True))
    mlpp = jnp.sum(full_mask * log_prob, axis=1) / jnp.sum(full_mask, axis=1)
    return -(temperature / base_temperature) * jnp.mean(mlpp)


if __name__ == "__main__":
    key = jax.random.PRNGKey(0)
    k1, k2 = jax.random.split(key)

    bsz, n_views, dim = 8, 2, 32
    features = jax.random.normal(k1, (bsz, n_views, dim), dtype=jnp.float32)
    # L2-normalize features (typical SupCon usage)
    features = features / jnp.linalg.norm(features, axis=-1, keepdims=True)
    labels = jax.random.randint(k2, (bsz,), 0, 3)

    # Supervised (labels), unsupervised SimCLR (no labels), explicit-mask path.
    loss_sup, stats_sup = sup_con_loss(features, labels=labels)
    loss_unsup, stats_unsup = sup_con_loss(features)
    mask = (labels.reshape(-1, 1) == labels.reshape(1, -1)).astype(jnp.float32)
    loss_mask, _ = sup_con_loss(features, mask=mask)

    jax.block_until_ready(loss_sup)
    jax.block_until_ready(loss_unsup)
    jax.block_until_ready(loss_mask)

    assert jnp.isfinite(loss_sup), "supervised loss is not finite"
    assert jnp.isfinite(loss_unsup), "unsupervised loss is not finite"
    assert jnp.isfinite(loss_mask), "mask-path loss is not finite"
    for group in stats_sup + stats_unsup:
        for v in group:
            assert jnp.isfinite(v), "stat is not finite"

    # The labels path and the explicit-mask path must agree (same math).
    assert jnp.allclose(loss_sup, loss_mask, atol=1e-5, rtol=1e-5), \
        "labels vs mask path mismatch"

    # Loose tolerance vs a pure-f32 reference (features hit the MXU as bf16).
    ref_sup = _reference_loss(features, labels=labels)
    ref_unsup = _reference_loss(features)
    assert jnp.allclose(loss_sup, ref_sup, rtol=0.1, atol=0.05), \
        f"supervised loss mismatch: {loss_sup} vs {ref_sup}"
    assert jnp.allclose(loss_unsup, ref_unsup, rtol=0.1, atol=0.05), \
        f"unsupervised loss mismatch: {loss_unsup} vs {ref_unsup}"

    print("KERNEL_OK")
</pallas_src>

<mosaic_0001>
module attributes {stable_mosaic.version = 11 : i64} {
  func.func @_supcon_labels_kernel(%arg0: i32, %arg1: memref<16x128xbf16, #tpu.memory_space<vmem>>, %arg2: memref<128x16xbf16, #tpu.memory_space<vmem>>, %arg3: memref<16x1xi32, #tpu.memory_space<vmem>>, %arg4: memref<1x16xi32, #tpu.memory_space<vmem>>, %arg5: memref<1x1x128xf32, #tpu.memory_space<vmem>>) attributes {dimension_semantics = [#tpu.dimension_semantics<parallel>], iteration_bounds = array<i64: 1>, scalar_prefetch = 0 : i64, scratch_operands = 0 : i64, tpu.core_type = #tpu.core_type<tc>, window_params = [{transform_indices = @transform_0, window_bounds = array<i64: 16, 128>}, {pipeline_mode = #tpu.pipeline_mode<synchronous>, transform_indices = @transform_1, window_bounds = array<i64: 128, 16>}, {transform_indices = @transform_2, window_bounds = array<i64: 16, 1>}, {pipeline_mode = #tpu.pipeline_mode<synchronous>, transform_indices = @transform_3, window_bounds = array<i64: 1, 16>}, {transform_indices = @transform_4, window_bounds = array<i64: 1, 1, 128>}]} {
    %c0 = arith.constant 0 : index
    %c0_0 = arith.constant 0 : index
    %0 = vector.load %arg1[%c0, %c0_0] : memref<16x128xbf16, #tpu.memory_space<vmem>>, vector<16x128xbf16>
    %c0_1 = arith.constant 0 : index
    %c0_2 = arith.constant 0 : index
    %1 = vector.load %arg2[%c0_1, %c0_2] : memref<128x16xbf16, #tpu.memory_space<vmem>>, vector<128x16xbf16>
    %cst = arith.constant dense<0.000000e+00> : vector<16x16xf32>
    %2 = tpu.matmul %0, %1, %cst {dimension_numbers = #tpu.dot_dimension_numbers<[1], [0], [0], [1], [0, 0, 1, 1], [], []>} : vector<16x128xbf16>, vector<128x16xbf16>, vector<16x16xf32> -> vector<16x16xf32>
    %c16_i32 = arith.constant 16 : i32
    %3 = arith.muli %arg0, %c16_i32 : i32
    %4 = tpu.iota {dimensions = array<i32: 0>} : vector<16x1xi32>
    %5 = vector.broadcast %3 : i32 to vector<16x1xi32>
    %6 = arith.addi %5, %4 : vector<16x1xi32>
    %7 = tpu.iota {dimensions = array<i32: 1>} : vector<16x16xi32>
    %8 = vector.broadcast %6 : vector<16x1xi32> to vector<16x16xi32>
    %9 = arith.cmpi eq, %7, %8 : vector<16x16xi32>
    %c16_i32_3 = arith.constant 16 : i32
    %10 = vector.broadcast %c16_i32_3 : i32 to vector<16x1xi32>
    %11 = arith.cmpi slt, %6, %10 : vector<16x1xi32>
    %c0_4 = arith.constant 0 : index
    %c0_5 = arith.constant 0 : index
    %12 = vector.load %arg3[%c0_4, %c0_5] : memref<16x1xi32, #tpu.memory_space<vmem>>, vector<16x1xi32>
    %c0_6 = arith.constant 0 : index
    %c0_7 = arith.constant 0 : index
    %13 = vector.load %arg4[%c0_6, %c0_7] : memref<1x16xi32, #tpu.memory_space<vmem>>, vector<1x16xi32>
    %14 = vector.broadcast %12 : vector<16x1xi32> to vector<16x16xi32>
    %15 = vector.broadcast %13 : vector<1x16xi32> to vector<16x16xi32>
    %16 = arith.cmpi eq, %14, %15 : vector<16x16xi32>
    %cst_8 = arith.constant dense<true> : vector<16x16xi1>
    %17 = arith.xori %9, %cst_8 : vector<16x16xi1>
    %18 = arith.andi %16, %17 : vector<16x16xi1>
    %cst_9 = arith.constant dense<0xFF800000> : vector<16xf32>
    %19 = vector.multi_reduction <maximumf>, %2, %cst_9 [1] : vector<16x16xf32> to vector<16xf32>
    %20 = vector.shape_cast %19 : vector<16xf32> to vector<16x1xf32>
    %21 = vector.broadcast %20 : vector<16x1xf32> to vector<16x16xf32>
    %22 = arith.subf %2, %21 : vector<16x16xf32>
    %23 = math.exp %22 : vector<16x16xf32>
    %cst_10 = arith.constant 0.000000e+00 : f32
    %24 = vector.broadcast %cst_10 : f32 to vector<16x16xf32>
    %25 = arith.select %9, %23, %24 : vector<16x16xi1>, vector<16x16xf32>
    %cst_11 = arith.constant dense<0.000000e+00> : vector<16xf32>
    %26 = vector.multi_reduction <add>, %25, %cst_11 [1] : vector<16x16xf32> to vector<16xf32>
    %27 = vector.shape_cast %26 : vector<16xf32> to vector<16x1xf32>
    %cst_12 = arith.constant dense<0.000000e+00> : vector<16xf32>
    %28 = vector.multi_reduction <add>, %23, %cst_12 [1] : vector<16x16xf32> to vector<16xf32>
    %29 = vector.shape_cast %28 : vector<16xf32> to vector<16x1xf32>
    %30 = arith.mulf %23, %23 : vector<16x16xf32>
    %cst_13 = arith.constant dense<0.000000e+00> : vector<16xf32>
    %31 = vector.multi_reduction <add>, %30, %cst_13 [1] : vector<16x16xf32> to vector<16xf32>
    %32 = vector.shape_cast %31 : vector<16xf32> to vector<16x1xf32>
    %33 = arith.subf %29, %27 : vector<16x1xf32>
    %34 = arith.mulf %27, %27 : vector<16x1xf32>
    %35 = arith.subf %32, %34 : vector<16x1xf32>
    %cst_14 = arith.constant 0xFF800000 : f32
    %36 = vector.broadcast %cst_14 : f32 to vector<16x16xf32>
    %37 = arith.select %9, %36, %22 : vector<16x16xi1>, vector<16x16xf32>
    %cst_15 = arith.constant dense<0xFF800000> : vector<16xf32>
    %38 = vector.multi_reduction <maximumf>, %37, %cst_15 [1] : vector<16x16xf32> to vector<16xf32>
    %39 = vector.shape_cast %38 : vector<16xf32> to vector<16x1xf32>
    %40 = math.exp %39 : vector<16x1xf32>
    %41 = math.log %33 : vector<16x1xf32>
    %cst_16 = arith.constant 1.000000e+00 : f32
    %cst_17 = arith.constant 0.000000e+00 : f32
    %42 = vector.broadcast %cst_16 : f32 to vector<16x16xf32>
    %43 = vector.broadcast %cst_17 : f32 to vector<16x16xf32>
    %44 = arith.select %18, %42, %43 : vector<16x16xi1>, vector<16x16xf32>
    %cst_18 = arith.constant dense<0.000000e+00> : vector<16xf32>
    %45 = vector.multi_reduction <add>, %44, %cst_18 [1] : vector<16x16xf32> to vector<16xf32>
    %46 = vector.shape_cast %45 : vector<16xf32> to vector<16x1xf32>
    %cst_19 = arith.constant 0.000000e+00 : f32
    %47 = vector.broadcast %cst_19 : f32 to vector<16x16xf32>
    %48 = arith.select %18, %22, %47 : vector<16x16xi1>, vector<16x16xf32>
    %cst_20 = arith.constant dense<0.000000e+00> : vector<16xf32>
    %49 = vector.multi_reduction <add>, %48, %cst_20 [1] : vector<16x16xf32> to vector<16xf32>
    %50 = vector.shape_cast %49 : vector<16xf32> to vector<16x1xf32>
    %cst_21 = arith.constant 0.000000e+00 : f32
    %51 = vector.broadcast %cst_21 : f32 to vector<16x1xf32>
    %52 = arith.cmpf ogt, %46, %51 : vector<16x1xf32>
    %53 = arith.mulf %46, %41 : vector<16x1xf32>
    %54 = arith.subf %50, %53 : vector<16x1xf32>
    %cst_22 = arith.constant 1.000000e+00 : f32
    %55 = vector.broadcast %cst_22 : f32 to vector<16x1xf32>
    %56 = arith.maximumf %46, %55 : vector<16x1xf32>
    %57 = arith.divf %54, %56 : vector<16x1xf32>
    %cst_23 = arith.constant 0.000000e+00 : f32
    %58 = vector.broadcast %cst_23 : f32 to vector<16x1xf32>
    %59 = arith.select %52, %57, %58 : vector<16x1xi1>, vector<16x1xf32>
    %cst_24 = arith.constant dense<0.000000e+00> : vector<16xf32>
    %60 = vector.multi_reduction <add>, %22, %cst_24 [1] : vector<16x16xf32> to vector<16xf32>
    %61 = vector.shape_cast %60 : vector<16xf32> to vector<16x1xf32>
    %62 = arith.mulf %22, %22 : vector<16x16xf32>
    %cst_25 = arith.constant dense<0.000000e+00> : vector<16xf32>
    %63 = vector.multi_reduction <add>, %62, %cst_25 [1] : vector<16x16xf32> to vector<16xf32>
    %64 = vector.shape_cast %63 : vector<16xf32> to vector<16x1xf32>
    %cst_26 = arith.constant dense<0x7F800000> : vector<16xf32>
    %65 = vector.multi_reduction <minimumf>, %22, %cst_26 [1] : vector<16x16xf32> to vector<16xf32>
    %66 = vector.shape_cast %65 : vector<16xf32> to vector<16x1xf32>
    %67 = math.exp %66 : vector<16x1xf32>
    %cst_27 = arith.constant 1.600000e+01 : f32
    %68 = vector.broadcast %cst_27 : f32 to vector<16x1xf32>
    %69 = arith.mulf %68, %41 : vector<16x1xf32>
    %70 = arith.subf %61, %69 : vector<16x1xf32>
    %cst_28 = arith.constant 2.000000e+00 : f32
    %71 = vector.broadcast %cst_28 : f32 to vector<16x1xf32>
    %72 = arith.mulf %71, %41 : vector<16x1xf32>
    %73 = arith.mulf %72, %61 : vector<16x1xf32>
    %74 = arith.subf %64, %73 : vector<16x1xf32>
    %cst_29 = arith.constant 1.600000e+01 : f32
    %75 = vector.broadcast %cst_29 : f32 to vector<16x1xf32>
    %76 = arith.mulf %75, %41 : vector<16x1xf32>
    %77 = arith.mulf %76, %41 : vector<16x1xf32>
    %78 = arith.addf %74, %77 : vector<16x1xf32>
    %cst_30 = arith.constant 0.000000e+00 : f32
    %79 = vector.broadcast %cst_30 : f32 to vector<16x1xf32>
    %80 = arith.subf %79, %41 : vector<16x1xf32>
    %81 = arith.subf %66, %41 : vector<16x1xf32>
    %cst_31 = arith.constant 0.000000e+00 : f32
    %82 = vector.broadcast %cst_31 : f32 to vector<16x1xf32>
    %83 = arith.select %11, %61, %82 : vector<16x1xi1>, vector<16x1xf32>
    %84 = vector.shape_cast %83 : vector<16x1xf32> to vector<1x16x1xf32>
    %cst_32 = arith.constant dense<0.000000e+00> : vector<1xf32>
    %85 = vector.multi_reduction <add>, %84, %cst_32 [1, 2] : vector<1x16x1xf32> to vector<1xf32>
    %86 = vector.shape_cast %85 : vector<1xf32> to vector<1x1x1xf32>
    %87 = vector.extract %86[0, 0, 0] : f32 from vector<1x1x1xf32>
    %88 = vector.broadcast %87 : f32 to vector<1x1xf32>
    %cst_33 = arith.constant 0.000000e+00 : f32
    %89 = vector.broadcast %cst_33 : f32 to vector<16x1xf32>
    %90 = arith.select %11, %64, %89 : vector<16x1xi1>, vector<16x1xf32>
    %91 = vector.shape_cast %90 : vector<16x1xf32> to vector<1x16x1xf32>
    %cst_34 = arith.constant dense<0.000000e+00> : vector<1xf32>
    %92 = vector.multi_reduction <add>, %91, %cst_34 [1, 2] : vector<1x16x1xf32> to vector<1xf32>
    %93 = vector.shape_cast %92 : vector<1xf32> to vector<1x1x1xf32>
    %94 = vector.extract %93[0, 0, 0] : f32 from vector<1x1x1xf32>
    %95 = vector.broadcast %94 : f32 to vector<1x1xf32>
    %cst_35 = arith.constant 0x7F800000 : f32
    %96 = vector.broadcast %cst_35 : f32 to vector<16x1xf32>
    %97 = arith.select %11, %66, %96 : vector<16x1xi1>, vector<16x1xf32>
    %98 = vector.shape_cast %97 : vector<16x1xf32> to vector<1x16x1xf32>
    %cst_36 = arith.constant dense<0x7F800000> : vector<1xf32>
    %99 = vector.multi_reduction <minimumf>, %98, %cst_36 [1, 2] : vector<1x16x1xf32> to vector<1xf32>
    %100 = vector.shape_cast %99 : vector<1xf32> to vector<1x1x1xf32>
    %101 = vector.extract %100[0, 0, 0] : f32 from vector<1x1x1xf32>
    %102 = vector.broadcast %101 : f32 to vector<1x1xf32>
    %cst_37 = arith.constant 0.000000e+00 : f32
    %103 = vector.broadcast %cst_37 : f32 to vector<16x1xf32>
    %104 = arith.select %11, %29, %103 : vector<16x1xi1>, vector<16x1xf32>
    %105 = vector.shape_cast %104 : vector<16x1xf32> to vector<1x16x1xf32>
    %cst_38 = arith.constant dense<0.000000e+00> : vector<1xf32>
    %106 = vector.multi_reduction <add>, %105, %cst_38 [1, 2] : vector<1x16x1xf32> to vector<1xf32>
    %107 = vector.shape_cast %106 : vector<1xf32> to vector<1x1x1xf32>
    %108 = vector.extract %107[0, 0, 0] : f32 from vector<1x1x1xf32>
    %109 = vector.broadcast %108 : f32 to vector<1x1xf32>
    %cst_39 = arith.constant 0.000000e+00 : f32
    %110 = vector.broadcast %cst_39 : f32 to vector<16x1xf32>
    %111 = arith.select %11, %32, %110 : vector<16x1xi1>, vector<16x1xf32>
    %112 = vector.shape_cast %111 : vector<16x1xf32> to vector<1x16x1xf32>
    %cst_40 = arith.constant dense<0.000000e+00> : vector<1xf32>
    %113 = vector.multi_reduction <add>, %112, %cst_40 [1, 2] : vector<1x16x1xf32> to vector<1xf32>
    %114 = vector.shape_cast %113 : vector<1xf32> to vector<1x1x1xf32>
    %115 = vector.extract %114[0, 0, 0] : f32 from vector<1x1x1xf32>
    %116 = vector.broadcast %115 : f32 to vector<1x1xf32>
    %cst_41 = arith.constant 0x7F800000 : f32
    %117 = vector.broadcast %cst_41 : f32 to vector<16x1xf32>
    %118 = arith.select %11, %67, %117 : vector<16x1xi1>, vector<16x1xf32>
    %119 = vector.shape_cast %118 : vector<16x1xf32> to vector<1x16x1xf32>
    %cst_42 = arith.constant dense<0x7F800000> : vector<1xf32>
    %120 = vector.multi_reduction <minimumf>, %119, %cst_42 [1, 2] : vector<1x16x1xf32> to vector<1xf32>
    %121 = vector.shape_cast %120 : vector<1xf32> to vector<1x1x1xf32>
    %122 = vector.extract %121[0, 0, 0] : f32 from vector<1x1x1xf32>
    %123 = vector.broadcast %122 : f32 to vector<1x1xf32>
    %cst_43 = arith.constant 0.000000e+00 : f32
    %124 = vector.broadcast %cst_43 : f32 to vector<16x1xf32>
    %125 = arith.select %11, %33, %124 : vector<16x1xi1>, vector<16x1xf32>
    %126 = vector.shape_cast %125 : vector<16x1xf32> to vector<1x16x1xf32>
    %cst_44 = arith.constant dense<0.000000e+00> : vector<1xf32>
    %127 = vector.multi_reduction <add>, %126, %cst_44 [1, 2] : vector<1x16x1xf32> to vector<1xf32>
    %128 = vector.shape_cast %127 : vector<1xf32> to vector<1x1x1xf32>
    %129 = vector.extract %128[0, 0, 0] : f32 from vector<1x1x1xf32>
    %130 = vector.broadcast %129 : f32 to vector<1x1xf32>
    %cst_45 = arith.constant 0.000000e+00 : f32
    %131 = vector.broadcast %cst_45 : f32 to vector<16x1xf32>
    %132 = arith.select %11, %35, %131 : vector<16x1xi1>, vector<16x1xf32>
    %133 = vector.shape_cast %132 : vector<16x1xf32> to vector<1x16x1xf32>
    %cst_46 = arith.constant dense<0.000000e+00> : vector<1xf32>
    %134 = vector.multi_reduction <add>, %133, %cst_46 [1, 2] : vector<1x16x1xf32> to vector<1xf32>
    %135 = vector.shape_cast %134 : vector<1xf32> to vector<1x1x1xf32>
    %136 = vector.extract %135[0, 0, 0] : f32 from vector<1x1x1xf32>
    %137 = vector.broadcast %136 : f32 to vector<1x1xf32>
    %cst_47 = arith.constant 0xFF800000 : f32
    %138 = vector.broadcast %cst_47 : f32 to vector<16x1xf32>
    %139 = arith.select %11, %40, %138 : vector<16x1xi1>, vector<16x1xf32>
    %140 = vector.shape_cast %139 : vector<16x1xf32> to vector<1x16x1xf32>
    %cst_48 = arith.constant dense<0xFF800000> : vector<1xf32>
    %141 = vector.multi_reduction <maximumf>, %140, %cst_48 [1, 2] : vector<1x16x1xf32> to vector<1xf32>
    %142 = vector.shape_cast %141 : vector<1xf32> to vector<1x1x1xf32>
    %143 = vector.extract %142[0, 0, 0] : f32 from vector<1x1x1xf32>
    %144 = vector.broadcast %143 : f32 to vector<1x1xf32>
    %cst_49 = arith.constant 0.000000e+00 : f32
    %145 = vector.broadcast %cst_49 : f32 to vector<16x1xf32>
    %146 = arith.select %11, %70, %145 : vector<16x1xi1>, vector<16x1xf32>
    %147 = vector.shape_cast %146 : vector<16x1xf32> to vector<1x16x1xf32>
    %cst_50 = arith.constant dense<0.000000e+00> : vector<1xf32>
    %148 = vector.multi_reduction <add>, %147, %cst_50 [1, 2] : vector<1x16x1xf32> to vector<1xf32>
    %149 = vector.shape_cast %148 : vector<1xf32> to vector<1x1x1xf32>
    %150 = vector.extract %149[0, 0, 0] : f32 from vector<1x1x1xf32>
    %151 = vector.broadcast %150 : f32 to vector<1x1xf32>
    %cst_51 = arith.constant 0.000000e+00 : f32
    %152 = vector.broadcast %cst_51 : f32 to vector<16x1xf32>
    %153 = arith.select %11, %78, %152 : vector<16x1xi1>, vector<16x1xf32>
    %154 = vector.shape_cast %153 : vector<16x1xf32> to vector<1x16x1xf32>
    %cst_52 = arith.constant dense<0.000000e+00> : vector<1xf32>
    %155 = vector.multi_reduction <add>, %154, %cst_52 [1, 2] : vector<1x16x1xf32> to vector<1xf32>
    %156 = vector.shape_cast %155 : vector<1xf32> to vector<1x1x1xf32>
    %157 = vector.extract %156[0, 0, 0] : f32 from vector<1x1x1xf32>
    %158 = vector.broadcast %157 : f32 to vector<1x1xf32>
    %cst_53 = arith.constant 0xFF800000 : f32
    %159 = vector.broadcast %cst_53 : f32 to vector<16x1xf32>
    %160 = arith.select %11, %80, %159 : vector<16x1xi1>, vector<16x1xf32>
    %161 = vector.shape_cast %160 : vector<16x1xf32> to vector<1x16x1xf32>
    %cst_54 = arith.constant dense<0xFF800000> : vector<1xf32>
    %162 = vector.multi_reduction <maximumf>, %161, %cst_54 [1, 2] : vector<1x16x1xf32> to vector<1xf32>
    %163 = vector.shape_cast %162 : vector<1xf32> to vector<1x1x1xf32>
    %164 = vector.extract %163[0, 0, 0] : f32 from vector<1x1x1xf32>
    %165 = vector.broadcast %164 : f32 to vector<1x1xf32>
    %cst_55 = arith.constant 0x7F800000 : f32
    %166 = vector.broadcast %cst_55 : f32 to vector<16x1xf32>
    %167 = arith.select %11, %81, %166 : vector<16x1xi1>, vector<16x1xf32>
    %168 = vector.shape_cast %167 : vector<16x1xf32> to vector<1x16x1xf32>
    %cst_56 = arith.constant dense<0x7F800000> : vector<1xf32>
    %169 = vector.multi_reduction <minimumf>, %168, %cst_56 [1, 2] : vector<1x16x1xf32> to vector<1xf32>
    %170 = vector.shape_cast %169 : vector<1xf32> to vector<1x1x1xf32>
    %171 = vector.extract %170[0, 0, 0] : f32 from vector<1x1x1xf32>
    %172 = vector.broadcast %171 : f32 to vector<1x1xf32>
    %cst_57 = arith.constant 0.000000e+00 : f32
    %173 = vector.broadcast %cst_57 : f32 to vector<16x1xf32>
    %174 = arith.select %11, %59, %173 : vector<16x1xi1>, vector<16x1xf32>
    %175 = vector.shape_cast %174 : vector<16x1xf32> to vector<1x16x1xf32>
    %cst_58 = arith.constant dense<0.000000e+00> : vector<1xf32>
    %176 = vector.multi_reduction <add>, %175, %cst_58 [1, 2] : vector<1x16x1xf32> to vector<1xf32>
    %177 = vector.shape_cast %176 : vector<1xf32> to vector<1x1x1xf32>
    %178 = vector.extract %177[0, 0, 0] : f32 from vector<1x1x1xf32>
    %179 = vector.broadcast %178 : f32 to vector<1x1xf32>
    %180 = arith.mulf %59, %59 : vector<16x1xf32>
    %cst_59 = arith.constant 0.000000e+00 : f32
    %181 = vector.broadcast %cst_59 : f32 to vector<16x1xf32>
    %182 = arith.select %11, %180, %181 : vector<16x1xi1>, vector<16x1xf32>
    %183 = vector.shape_cast %182 : vector<16x1xf32> to vector<1x16x1xf32>
    %cst_60 = arith.constant dense<0.000000e+00> : vector<1xf32>
    %184 = vector.multi_reduction <add>, %183, %cst_60 [1, 2] : vector<1x16x1xf32> to vector<1xf32>
    %185 = vector.shape_cast %184 : vector<1xf32> to vector<1x1x1xf32>
    %186 = vector.extract %185[0, 0, 0] : f32 from vector<1x1x1xf32>
    %187 = vector.broadcast %186 : f32 to vector<1x1xf32>
    %cst_61 = arith.constant 0xFF800000 : f32
    %188 = vector.broadcast %cst_61 : f32 to vector<16x1xf32>
    %189 = arith.select %11, %59, %188 : vector<16x1xi1>, vector<16x1xf32>
    %190 = vector.shape_cast %189 : vector<16x1xf32> to vector<1x16x1xf32>
    %cst_62 = arith.constant dense<0xFF800000> : vector<1xf32>
    %191 = vector.multi_reduction <maximumf>, %190, %cst_62 [1, 2] : vector<1x16x1xf32> to vector<1xf32>
    %192 = vector.shape_cast %191 : vector<1xf32> to vector<1x1x1xf32>
    %193 = vector.extract %192[0, 0, 0] : f32 from vector<1x1x1xf32>
    %194 = vector.broadcast %193 : f32 to vector<1x1xf32>
    %cst_63 = arith.constant 0x7F800000 : f32
    %195 = vector.broadcast %cst_63 : f32 to vector<16x1xf32>
    %196 = arith.select %11, %59, %195 : vector<16x1xi1>, vector<16x1xf32>
    %197 = vector.shape_cast %196 : vector<16x1xf32> to vector<1x16x1xf32>
    %cst_64 = arith.constant dense<0x7F800000> : vector<1xf32>
    %198 = vector.multi_reduction <minimumf>, %197, %cst_64 [1, 2] : vector<1x16x1xf32> to vector<1xf32>
    %199 = vector.shape_cast %198 : vector<1xf32> to vector<1x1x1xf32>
    %200 = vector.extract %199[0, 0, 0] : f32 from vector<1x1x1xf32>
    %201 = vector.broadcast %200 : f32 to vector<1x1xf32>
    %202 = tpu.iota {dimensions = array<i32: 2>} : vector<1x1x128xi32>
    %cst_65 = arith.constant 0.000000e+00 : f32
    %203 = vector.broadcast %cst_65 : f32 to vector<1x1x128xf32>
    %c0_i32 = arith.constant 0 : i32
    %204 = vector.broadcast %c0_i32 : i32 to vector<1x1x128xi32>
    %205 = arith.cmpi eq, %202, %204 : vector<1x1x128xi32>
    %206 = vector.shape_cast %88 : vector<1x1xf32> to vector<1x1x1xf32>
    %207 = vector.broadcast %206 : vector<1x1x1xf32> to vector<1x1x128xf32>
    %208 = arith.select %205, %207, %203 : vector<1x1x128xi1>, vector<1x1x128xf32>
    %c1_i32 = arith.constant 1 : i32
    %209 = vector.broadcast %c1_i32 : i32 to vector<1x1x128xi32>
    %210 = arith.cmpi eq, %202, %209 : vector<1x1x128xi32>
    %211 = vector.shape_cast %95 : vector<1x1xf32> to vector<1x1x1xf32>
    %212 = vector.broadcast %211 : vector<1x1x1xf32> to vector<1x1x128xf32>
    %213 = arith.select %210, %212, %208 : vector<1x1x128xi1>, vector<1x1x128xf32>
    %c2_i32 = arith.constant 2 : i32
    %214 = vector.broadcast %c2_i32 : i32 to vector<1x1x128xi32>
    %215 = arith.cmpi eq, %202, %214 : vector<1x1x128xi32>
    %cst_66 = arith.constant 0.000000e+00 : f32
    %216 = vector.broadcast %cst_66 : f32 to vector<1x1x128xf32>
    %217 = arith.select %215, %216, %213 : vector<1x1x128xi1>, vector<1x1x128xf32>
    %c3_i32 = arith.constant 3 : i32
    %218 = vector.broadcast %c3_i32 : i32 to vector<1x1x128xi32>
    %219 = arith.cmpi eq, %202, %218 : vector<1x1x128xi32>
    %220 = vector.shape_cast %102 : vector<1x1xf32> to vector<1x1x1xf32>
    %221 = vector.broadcast %220 : vector<1x1x1xf32> to vector<1x1x128xf32>
    %222 = arith.select %219, %221, %217 : vector<1x1x128xi1>, vector<1x1x128xf32>
    %c4_i32 = arith.constant 4 : i32
    %223 = vector.broadcast %c4_i32 : i32 to vector<1x1x128xi32>
    %224 = arith.cmpi eq, %202, %223 : vector<1x1x128xi32>
    %225 = vector.shape_cast %109 : vector<1x1xf32> to vector<1x1x1xf32>
    %226 = vector.broadcast %225 : vector<1x1x1xf32> to vector<1x1x128xf32>
    %227 = arith.select %224, %226, %222 : vector<1x1x128xi1>, vector<1x1x128xf32>
    %c5_i32 = arith.constant 5 : i32
    %228 = vector.broadcast %c5_i32 : i32 to vector<1x1x128xi32>
    %229 = arith.cmpi eq, %202, %228 : vector<1x1x128xi32>
    %230 = vector.shape_cast %116 : vector<1x1xf32> to vector<1x1x1xf32>
    %231 = vector.broadcast %230 : vector<1x1x1xf32> to vector<1x1x128xf32>
    %232 = arith.select %229, %231, %227 : vector<1x1x128xi1>, vector<1x1x128xf32>
    %c6_i32 = arith.constant 6 : i32
    %233 = vector.broadcast %c6_i32 : i32 to vector<1x1x128xi32>
    %234 = arith.cmpi eq, %202, %233 : vector<1x1x128xi32>
    %cst_67 = arith.constant 1.000000e+00 : f32
    %235 = vector.broadcast %cst_67 : f32 to vector<1x1x128xf32>
    %236 = arith.select %234, %235, %232 : vector<1x1x128xi1>, vector<1x1x128xf32>
    %c7_i32 = arith.constant 7 : i32
    %237 = vector.broadcast %c7_i32 : i32 to vector<1x1x128xi32>
    %238 = arith.cmpi eq, %202, %237 : vector<1x1x128xi32>
    %239 = vector.shape_cast %123 : vector<1x1xf32> to vector<1x1x1xf32>
    %240 = vector.broadcast %239 : vector<1x1x1xf32> to vector<1x1x128xf32>
    %241 = arith.select %238, %240, %236 : vector<1x1x128xi1>, vector<1x1x128xf32>
    %c8_i32 = arith.constant 8 : i32
    %242 = vector.broadcast %c8_i32 : i32 to vector<1x1x128xi32>
    %243 = arith.cmpi eq, %202, %242 : vector<1x1x128xi32>
    %244 = vector.shape_cast %130 : vector<1x1xf32> to vector<1x1x1xf32>
    %245 = vector.broadcast %244 : vector<1x1x1xf32> to vector<1x1x128xf32>
    %246 = arith.select %243, %245, %241 : vector<1x1x128xi1>, vector<1x1x128xf32>
    %c9_i32 = arith.constant 9 : i32
    %247 = vector.broadcast %c9_i32 : i32 to vector<1x1x128xi32>
    %248 = arith.cmpi eq, %202, %247 : vector<1x1x128xi32>
    %249 = vector.shape_cast %137 : vector<1x1xf32> to vector<1x1x1xf32>
    %250 = vector.broadcast %249 : vector<1x1x1xf32> to vector<1x1x128xf32>
    %251 = arith.select %248, %250, %246 : vector<1x1x128xi1>, vector<1x1x128xf32>
    %c10_i32 = arith.constant 10 : i32
    %252 = vector.broadcast %c10_i32 : i32 to vector<1x1x128xi32>
    %253 = arith.cmpi eq, %202, %252 : vector<1x1x128xi32>
    %254 = vector.shape_cast %144 : vector<1x1xf32> to vector<1x1x1xf32>
    %255 = vector.broadcast %254 : vector<1x1x1xf32> to vector<1x1x128xf32>
    %256 = arith.select %253, %255, %251 : vector<1x1x128xi1>, vector<1x1x128xf32>
    %c11_i32 = arith.constant 11 : i32
    %257 = vector.broadcast %c11_i32 : i32 to vector<1x1x128xi32>
    %258 = arith.cmpi eq, %202, %257 : vector<1x1x128xi32>
    %cst_68 = arith.constant 0.000000e+00 : f32
    %259 = vector.broadcast %cst_68 : f32 to vector<1x1x128xf32>
    %260 = arith.select %258, %259, %256 : vector<1x1x128xi1>, vector<1x1x128xf32>
    %c12_i32 = arith.constant 12 : i32
    %261 = vector.broadcast %c12_i32 : i32 to vector<1x1x128xi32>
    %262 = arith.cmpi eq, %202, %261 : vector<1x1x128xi32>
    %263 = vector.shape_cast %151 : vector<1x1xf32> to vector<1x1x1xf32>
    %264 = vector.broadcast %263 : vector<1x1x1xf32> to vector<1x1x128xf32>
    %265 = arith.select %262, %264, %260 : vector<1x1x128xi1>, vector<1x1x128xf32>
    %c13_i32 = arith.constant 13 : i32
    %266 = vector.broadcast %c13_i32 : i32 to vector<1x1x128xi32>
    %267 = arith.cmpi eq, %202, %266 : vector<1x1x128xi32>
    %268 = vector.shape_cast %158 : vector<1x1xf32> to vector<1x1x1xf32>
    %269 = vector.broadcast %268 : vector<1x1x1xf32> to vector<1x1x128xf32>
    %270 = arith.select %267, %269, %265 : vector<1x1x128xi1>, vector<1x1x128xf32>
    %c14_i32 = arith.constant 14 : i32
    %271 = vector.broadcast %c14_i32 : i32 to vector<1x1x128xi32>
    %272 = arith.cmpi eq, %202, %271 : vector<1x1x128xi32>
    %273 = vector.shape_cast %165 : vector<1x1xf32> to vector<1x1x1xf32>
    %274 = vector.broadcast %273 : vector<1x1x1xf32> to vector<1x1x128xf32>
    %275 = arith.select %272, %274, %270 : vector<1x1x128xi1>, vector<1x1x128xf32>
    %c15_i32 = arith.constant 15 : i32
    %276 = vector.broadcast %c15_i32 : i32 to vector<1x1x128xi32>
    %277 = arith.cmpi eq, %202, %276 : vector<1x1x128xi32>
    %278 = vector.shape_cast %172 : vector<1x1xf32> to vector<1x1x1xf32>
    %279 = vector.broadcast %278 : vector<1x1x1xf32> to vector<1x1x128xf32>
    %280 = arith.select %277, %279, %275 : vector<1x1x128xi1>, vector<1x1x128xf32>
    %c16_i32_69 = arith.constant 16 : i32
    %281 = vector.broadcast %c16_i32_69 : i32 to vector<1x1x128xi32>
    %282 = arith.cmpi eq, %202, %281 : vector<1x1x128xi32>
    %283 = vector.shape_cast %179 : vector<1x1xf32> to vector<1x1x1xf32>
    %284 = vector.broadcast %283 : vector<1x1x1xf32> to vector<1x1x128xf32>
    %285 = arith.select %282, %284, %280 : vector<1x1x128xi1>, vector<1x1x128xf32>
    %c17_i32 = arith.constant 17 : i32
    %286 = vector.broadcast %c17_i32 : i32 to vector<1x1x128xi32>
    %287 = arith.cmpi eq, %202, %286 : vector<1x1x128xi32>
    %288 = vector.shape_cast %187 : vector<1x1xf32> to vector<1x1x1xf32>
    %289 = vector.broadcast %288 : vector<1x1x1xf32> to vector<1x1x128xf32>
    %290 = arith.select %287, %289, %285 : vector<1x1x128xi1>, vector<1x1x128xf32>
    %c18_i32 = arith.constant 18 : i32
    %291 = vector.broadcast %c18_i32 : i32 to vector<1x1x128xi32>
    %292 = arith.cmpi eq, %202, %291 : vector<1x1x128xi32>
    %293 = vector.shape_cast %194 : vector<1x1xf32> to vector<1x1x1xf32>
    %294 = vector.broadcast %293 : vector<1x1x1xf32> to vector<1x1x128xf32>
    %295 = arith.select %292, %294, %290 : vector<1x1x128xi1>, vector<1x1x128xf32>
    %c19_i32 = arith.constant 19 : i32
    %296 = vector.broadcast %c19_i32 : i32 to vector<1x1x128xi32>
    %297 = arith.cmpi eq, %202, %296 : vector<1x1x128xi32>
    %298 = vector.shape_cast %201 : vector<1x1xf32> to vector<1x1x1xf32>
    %299 = vector.broadcast %298 : vector<1x1x1xf32> to vector<1x1x128xf32>
    %300 = arith.select %297, %299, %295 : vector<1x1x128xi1>, vector<1x1x128xf32>
    %c0_70 = arith.constant 0 : index
    %c0_71 = arith.constant 0 : index
    %c0_72 = arith.constant 0 : index
    %301 = vector.load %arg5[%c0_70, %c0_71, %c0_72] : memref<1x1x128xf32, #tpu.memory_space<vmem>>, vector<1x1x128xf32>
    tpu.vector_store %arg5[%c0_70, %c0_71, %c0_72], %300 {strides = array<i32>} : memref<1x1x128xf32, #tpu.memory_space<vmem>>, vector<1x1x128xf32>,
    return
  }
  func.func @transform_0(%arg0: i32) -> (i32, i32) {
    %c0_i32 = arith.constant 0 : i32
    %c0_i32_0 = arith.constant 0 : i32
    return %arg0, %c0_i32 : i32, i32
  }
  func.func @transform_1(%arg0: i32) -> (i32, i32) {
    %c0_i32 = arith.constant 0 : i32
    %c0_i32_0 = arith.constant 0 : i32
    %c0_i32_1 = arith.constant 0 : i32
    return %c0_i32, %c0_i32_0 : i32, i32
  }
  func.func @transform_2(%arg0: i32) -> (i32, i32) {
    %c0_i32 = arith.constant 0 : i32
    %c0_i32_0 = arith.constant 0 : i32
    return %arg0, %c0_i32 : i32, i32
  }
  func.func @transform_3(%arg0: i32) -> (i32, i32) {
    %c0_i32 = arith.constant 0 : i32
    %c0_i32_0 = arith.constant 0 : i32
    %c0_i32_1 = arith.constant 0 : i32
    return %c0_i32, %c0_i32_0 : i32, i32
  }
  func.func @transform_4(%arg0: i32) -> (i32, i32, i32) {
    %c0_i32 = arith.constant 0 : i32
    %c0_i32_0 = arith.constant 0 : i32
    %c0_i32_1 = arith.constant 0 : i32
    return %arg0, %c0_i32, %c0_i32_0 : i32, i32, i32
  }
}

module attributes {stable_mosaic.version = 11 : i64} {
  func.func @_supcon_labels_kernel(%arg0: i32, %arg1: memref<16x128xbf16, #tpu.memory_space<vmem>>, %arg2: memref<128x16xbf16, #tpu.memory_space<vmem>>, %arg3: memref<16x1xi32, #tpu.memory_space<vmem>>, %arg4: memref<1x16xi32, #tpu.memory_space<vmem>>, %arg5: memref<1x1x128xf32, #tpu.memory_space<vmem>>) attributes {dimension_semantics = [#tpu.dimension_semantics<parallel>], iteration_bounds = array<i64: 1>, scalar_prefetch = 0 : i64, scratch_operands = 0 : i64, tpu.core_type = #tpu.core_type<tc>, window_params = [{transform_indices = @transform_0, window_bounds = array<i64: 16, 128>}, {pipeline_mode = #tpu.pipeline_mode<synchronous>, transform_indices = @transform_1, window_bounds = array<i64: 128, 16>}, {transform_indices = @transform_2, window_bounds = array<i64: 16, 1>}, {pipeline_mode = #tpu.pipeline_mode<synchronous>, transform_indices = @transform_3, window_bounds = array<i64: 1, 16>}, {transform_indices = @transform_4, window_bounds = array<i64: 1, 1, 128>}]} {
    %c0 = arith.constant 0 : index
    %c0_0 = arith.constant 0 : index
    %0 = vector.load %arg1[%c0, %c0_0] : memref<16x128xbf16, #tpu.memory_space<vmem>>, vector<16x128xbf16>
    %c0_1 = arith.constant 0 : index
    %c0_2 = arith.constant 0 : index
    %1 = vector.load %arg2[%c0_1, %c0_2] : memref<128x16xbf16, #tpu.memory_space<vmem>>, vector<128x16xbf16>
    %cst = arith.constant dense<0.000000e+00> : vector<16x16xf32>
    %2 = tpu.matmul %0, %1, %cst {dimension_numbers = #tpu.dot_dimension_numbers<[1], [0], [0], [1], [0, 0, 1, 1], [], []>} : vector<16x128xbf16>, vector<128x16xbf16>, vector<16x16xf32> -> vector<16x16xf32>
    %c16_i32 = arith.constant 16 : i32
    %3 = arith.muli %arg0, %c16_i32 : i32
    %4 = tpu.iota {dimensions = array<i32: 0>} : vector<16x1xi32>
    %5 = vector.broadcast %3 : i32 to vector<16x1xi32>
    %6 = arith.addi %5, %4 : vector<16x1xi32>
    %7 = tpu.iota {dimensions = array<i32: 1>} : vector<16x16xi32>
    %8 = vector.broadcast %6 : vector<16x1xi32> to vector<16x16xi32>
    %9 = arith.cmpi eq, %7, %8 : vector<16x16xi32>
    %c16_i32_3 = arith.constant 16 : i32
    %10 = vector.broadcast %c16_i32_3 : i32 to vector<16x1xi32>
    %11 = arith.cmpi slt, %6, %10 : vector<16x1xi32>
    %c0_4 = arith.constant 0 : index
    %c0_5 = arith.constant 0 : index
    %12 = vector.load %arg3[%c0_4, %c0_5] : memref<16x1xi32, #tpu.memory_space<vmem>>, vector<16x1xi32>
    %c0_6 = arith.constant 0 : index
    %c0_7 = arith.constant 0 : index
    %13 = vector.load %arg4[%c0_6, %c0_7] : memref<1x16xi32, #tpu.memory_space<vmem>>, vector<1x16xi32>
    %14 = vector.broadcast %12 : vector<16x1xi32> to vector<16x16xi32>
    %15 = vector.broadcast %13 : vector<1x16xi32> to vector<16x16xi32>
    %16 = arith.cmpi eq, %14, %15 : vector<16x16xi32>
    %cst_8 = arith.constant dense<true> : vector<16x16xi1>
    %17 = arith.xori %9, %cst_8 : vector<16x16xi1>
    %18 = arith.andi %16, %17 : vector<16x16xi1>
    %cst_9 = arith.constant dense<0xFF800000> : vector<16xf32>
    %19 = vector.multi_reduction <maximumf>, %2, %cst_9 [1] : vector<16x16xf32> to vector<16xf32>
    %20 = vector.shape_cast %19 : vector<16xf32> to vector<16x1xf32>
    %21 = vector.broadcast %20 : vector<16x1xf32> to vector<16x16xf32>
    %22 = arith.subf %2, %21 : vector<16x16xf32>
    %23 = math.exp %22 : vector<16x16xf32>
    %cst_10 = arith.constant 0.000000e+00 : f32
    %24 = vector.broadcast %cst_10 : f32 to vector<16x16xf32>
    %25 = arith.select %9, %23, %24 : vector<16x16xi1>, vector<16x16xf32>
    %cst_11 = arith.constant dense<0.000000e+00> : vector<16xf32>
    %26 = vector.multi_reduction <add>, %25, %cst_11 [1] : vector<16x16xf32> to vector<16xf32>
    %27 = vector.shape_cast %26 : vector<16xf32> to vector<16x1xf32>
    %cst_12 = arith.constant dense<0.000000e+00> : vector<16xf32>
    %28 = vector.multi_reduction <add>, %23, %cst_12 [1] : vector<16x16xf32> to vector<16xf32>
    %29 = vector.shape_cast %28 : vector<16xf32> to vector<16x1xf32>
    %30 = arith.mulf %23, %23 : vector<16x16xf32>
    %cst_13 = arith.constant dense<0.000000e+00> : vector<16xf32>
    %31 = vector.multi_reduction <add>, %30, %cst_13 [1] : vector<16x16xf32> to vector<16xf32>
    %32 = vector.shape_cast %31 : vector<16xf32> to vector<16x1xf32>
    %33 = arith.subf %29, %27 : vector<16x1xf32>
    %34 = arith.mulf %27, %27 : vector<16x1xf32>
    %35 = arith.subf %32, %34 : vector<16x1xf32>
    %cst_14 = arith.constant 0xFF800000 : f32
    %36 = vector.broadcast %cst_14 : f32 to vector<16x16xf32>
    %37 = arith.select %9, %36, %22 : vector<16x16xi1>, vector<16x16xf32>
    %cst_15 = arith.constant dense<0xFF800000> : vector<16xf32>
    %38 = vector.multi_reduction <maximumf>, %37, %cst_15 [1] : vector<16x16xf32> to vector<16xf32>
    %39 = vector.shape_cast %38 : vector<16xf32> to vector<16x1xf32>
    %40 = math.exp %39 : vector<16x1xf32>
    %41 = math.log %33 : vector<16x1xf32>
    %cst_16 = arith.constant 1.000000e+00 : f32
    %cst_17 = arith.constant 0.000000e+00 : f32
    %42 = vector.broadcast %cst_16 : f32 to vector<16x16xf32>
    %43 = vector.broadcast %cst_17 : f32 to vector<16x16xf32>
    %44 = arith.select %18, %42, %43 : vector<16x16xi1>, vector<16x16xf32>
    %cst_18 = arith.constant dense<0.000000e+00> : vector<16xf32>
    %45 = vector.multi_reduction <add>, %44, %cst_18 [1] : vector<16x16xf32> to vector<16xf32>
    %46 = vector.shape_cast %45 : vector<16xf32> to vector<16x1xf32>
    %cst_19 = arith.constant 0.000000e+00 : f32
    %47 = vector.broadcast %cst_19 : f32 to vector<16x16xf32>
    %48 = arith.select %18, %22, %47 : vector<16x16xi1>, vector<16x16xf32>
    %cst_20 = arith.constant dense<0.000000e+00> : vector<16xf32>
    %49 = vector.multi_reduction <add>, %48, %cst_20 [1] : vector<16x16xf32> to vector<16xf32>
    %50 = vector.shape_cast %49 : vector<16xf32> to vector<16x1xf32>
    %cst_21 = arith.constant 0.000000e+00 : f32
    %51 = vector.broadcast %cst_21 : f32 to vector<16x1xf32>
    %52 = arith.cmpf ogt, %46, %51 : vector<16x1xf32>
    %53 = arith.mulf %46, %41 : vector<16x1xf32>
    %54 = arith.subf %50, %53 : vector<16x1xf32>
    %cst_22 = arith.constant 1.000000e+00 : f32
    %55 = vector.broadcast %cst_22 : f32 to vector<16x1xf32>
    %56 = arith.maximumf %46, %55 : vector<16x1xf32>
    %57 = arith.divf %54, %56 : vector<16x1xf32>
    %cst_23 = arith.constant 0.000000e+00 : f32
    %58 = vector.broadcast %cst_23 : f32 to vector<16x1xf32>
    %59 = arith.select %52, %57, %58 : vector<16x1xi1>, vector<16x1xf32>
    %cst_24 = arith.constant dense<0.000000e+00> : vector<16xf32>
    %60 = vector.multi_reduction <add>, %22, %cst_24 [1] : vector<16x16xf32> to vector<16xf32>
    %61 = vector.shape_cast %60 : vector<16xf32> to vector<16x1xf32>
    %62 = arith.mulf %22, %22 : vector<16x16xf32>
    %cst_25 = arith.constant dense<0.000000e+00> : vector<16xf32>
    %63 = vector.multi_reduction <add>, %62, %cst_25 [1] : vector<16x16xf32> to vector<16xf32>
    %64 = vector.shape_cast %63 : vector<16xf32> to vector<16x1xf32>
    %cst_26 = arith.constant dense<0x7F800000> : vector<16xf32>
    %65 = vector.multi_reduction <minimumf>, %22, %cst_26 [1] : vector<16x16xf32> to vector<16xf32>
    %66 = vector.shape_cast %65 : vector<16xf32> to vector<16x1xf32>
    %67 = math.exp %66 : vector<16x1xf32>
    %cst_27 = arith.constant 1.600000e+01 : f32
    %68 = vector.broadcast %cst_27 : f32 to vector<16x1xf32>
    %69 = arith.mulf %68, %41 : vector<16x1xf32>
    %70 = arith.subf %61, %69 : vector<16x1xf32>
    %cst_28 = arith.constant 2.000000e+00 : f32
    %71 = vector.broadcast %cst_28 : f32 to vector<16x1xf32>
    %72 = arith.mulf %71, %41 : vector<16x1xf32>
    %73 = arith.mulf %72, %61 : vector<16x1xf32>
    %74 = arith.subf %64, %73 : vector<16x1xf32>
    %cst_29 = arith.constant 1.600000e+01 : f32
    %75 = vector.broadcast %cst_29 : f32 to vector<16x1xf32>
    %76 = arith.mulf %75, %41 : vector<16x1xf32>
    %77 = arith.mulf %76, %41 : vector<16x1xf32>
    %78 = arith.addf %74, %77 : vector<16x1xf32>
    %cst_30 = arith.constant 0.000000e+00 : f32
    %79 = vector.broadcast %cst_30 : f32 to vector<16x1xf32>
    %80 = arith.subf %79, %41 : vector<16x1xf32>
    %81 = arith.subf %66, %41 : vector<16x1xf32>
    %cst_31 = arith.constant 0.000000e+00 : f32
    %82 = vector.broadcast %cst_31 : f32 to vector<16x1xf32>
    %83 = arith.select %11, %61, %82 : vector<16x1xi1>, vector<16x1xf32>
    %84 = vector.shape_cast %83 : vector<16x1xf32> to vector<1x16x1xf32>
    %cst_32 = arith.constant dense<0.000000e+00> : vector<1xf32>
    %85 = vector.multi_reduction <add>, %84, %cst_32 [1, 2] : vector<1x16x1xf32> to vector<1xf32>
    %86 = vector.shape_cast %85 : vector<1xf32> to vector<1x1x1xf32>
    %87 = vector.extract %86[0, 0, 0] : f32 from vector<1x1x1xf32>
    %88 = vector.broadcast %87 : f32 to vector<1x1xf32>
    %cst_33 = arith.constant 0.000000e+00 : f32
    %89 = vector.broadcast %cst_33 : f32 to vector<16x1xf32>
    %90 = arith.select %11, %64, %89 : vector<16x1xi1>, vector<16x1xf32>
    %91 = vector.shape_cast %90 : vector<16x1xf32> to vector<1x16x1xf32>
    %cst_34 = arith.constant dense<0.000000e+00> : vector<1xf32>
    %92 = vector.multi_reduction <add>, %91, %cst_34 [1, 2] : vector<1x16x1xf32> to vector<1xf32>
    %93 = vector.shape_cast %92 : vector<1xf32> to vector<1x1x1xf32>
    %94 = vector.extract %93[0, 0, 0] : f32 from vector<1x1x1xf32>
    %95 = vector.broadcast %94 : f32 to vector<1x1xf32>
    %cst_35 = arith.constant 0x7F800000 : f32
    %96 = vector.broadcast %cst_35 : f32 to vector<16x1xf32>
    %97 = arith.select %11, %66, %96 : vector<16x1xi1>, vector<16x1xf32>
    %98 = vector.shape_cast %97 : vector<16x1xf32> to vector<1x16x1xf32>
    %cst_36 = arith.constant dense<0x7F800000> : vector<1xf32>
    %99 = vector.multi_reduction <minimumf>, %98, %cst_36 [1, 2] : vector<1x16x1xf32> to vector<1xf32>
    %100 = vector.shape_cast %99 : vector<1xf32> to vector<1x1x1xf32>
    %101 = vector.extract %100[0, 0, 0] : f32 from vector<1x1x1xf32>
    %102 = vector.broadcast %101 : f32 to vector<1x1xf32>
    %cst_37 = arith.constant 0.000000e+00 : f32
    %103 = vector.broadcast %cst_37 : f32 to vector<16x1xf32>
    %104 = arith.select %11, %29, %103 : vector<16x1xi1>, vector<16x1xf32>
    %105 = vector.shape_cast %104 : vector<16x1xf32> to vector<1x16x1xf32>
    %cst_38 = arith.constant dense<0.000000e+00> : vector<1xf32>
    %106 = vector.multi_reduction <add>, %105, %cst_38 [1, 2] : vector<1x16x1xf32> to vector<1xf32>
    %107 = vector.shape_cast %106 : vector<1xf32> to vector<1x1x1xf32>
    %108 = vector.extract %107[0, 0, 0] : f32 from vector<1x1x1xf32>
    %109 = vector.broadcast %108 : f32 to vector<1x1xf32>
    %cst_39 = arith.constant 0.000000e+00 : f32
    %110 = vector.broadcast %cst_39 : f32 to vector<16x1xf32>
    %111 = arith.select %11, %32, %110 : vector<16x1xi1>, vector<16x1xf32>
    %112 = vector.shape_cast %111 : vector<16x1xf32> to vector<1x16x1xf32>
    %cst_40 = arith.constant dense<0.000000e+00> : vector<1xf32>
    %113 = vector.multi_reduction <add>, %112, %cst_40 [1, 2] : vector<1x16x1xf32> to vector<1xf32>
    %114 = vector.shape_cast %113 : vector<1xf32> to vector<1x1x1xf32>
    %115 = vector.extract %114[0, 0, 0] : f32 from vector<1x1x1xf32>
    %116 = vector.broadcast %115 : f32 to vector<1x1xf32>
    %cst_41 = arith.constant 0x7F800000 : f32
    %117 = vector.broadcast %cst_41 : f32 to vector<16x1xf32>
    %118 = arith.select %11, %67, %117 : vector<16x1xi1>, vector<16x1xf32>
    %119 = vector.shape_cast %118 : vector<16x1xf32> to vector<1x16x1xf32>
    %cst_42 = arith.constant dense<0x7F800000> : vector<1xf32>
    %120 = vector.multi_reduction <minimumf>, %119, %cst_42 [1, 2] : vector<1x16x1xf32> to vector<1xf32>
    %121 = vector.shape_cast %120 : vector<1xf32> to vector<1x1x1xf32>
    %122 = vector.extract %121[0, 0, 0] : f32 from vector<1x1x1xf32>
    %123 = vector.broadcast %122 : f32 to vector<1x1xf32>
    %cst_43 = arith.constant 0.000000e+00 : f32
    %124 = vector.broadcast %cst_43 : f32 to vector<16x1xf32>
    %125 = arith.select %11, %33, %124 : vector<16x1xi1>, vector<16x1xf32>
    %126 = vector.shape_cast %125 : vector<16x1xf32> to vector<1x16x1xf32>
    %cst_44 = arith.constant dense<0.000000e+00> : vector<1xf32>
    %127 = vector.multi_reduction <add>, %126, %cst_44 [1, 2] : vector<1x16x1xf32> to vector<1xf32>
    %128 = vector.shape_cast %127 : vector<1xf32> to vector<1x1x1xf32>
    %129 = vector.extract %128[0, 0, 0] : f32 from vector<1x1x1xf32>
    %130 = vector.broadcast %129 : f32 to vector<1x1xf32>
    %cst_45 = arith.constant 0.000000e+00 : f32
    %131 = vector.broadcast %cst_45 : f32 to vector<16x1xf32>
    %132 = arith.select %11, %35, %131 : vector<16x1xi1>, vector<16x1xf32>
    %133 = vector.shape_cast %132 : vector<16x1xf32> to vector<1x16x1xf32>
    %cst_46 = arith.constant dense<0.000000e+00> : vector<1xf32>
    %134 = vector.multi_reduction <add>, %133, %cst_46 [1, 2] : vector<1x16x1xf32> to vector<1xf32>
    %135 = vector.shape_cast %134 : vector<1xf32> to vector<1x1x1xf32>
    %136 = vector.extract %135[0, 0, 0] : f32 from vector<1x1x1xf32>
    %137 = vector.broadcast %136 : f32 to vector<1x1xf32>
    %cst_47 = arith.constant 0xFF800000 : f32
    %138 = vector.broadcast %cst_47 : f32 to vector<16x1xf32>
    %139 = arith.select %11, %40, %138 : vector<16x1xi1>, vector<16x1xf32>
    %140 = vector.shape_cast %139 : vector<16x1xf32> to vector<1x16x1xf32>
    %cst_48 = arith.constant dense<0xFF800000> : vector<1xf32>
    %141 = vector.multi_reduction <maximumf>, %140, %cst_48 [1, 2] : vector<1x16x1xf32> to vector<1xf32>
    %142 = vector.shape_cast %141 : vector<1xf32> to vector<1x1x1xf32>
    %143 = vector.extract %142[0, 0, 0] : f32 from vector<1x1x1xf32>
    %144 = vector.broadcast %143 : f32 to vector<1x1xf32>
    %cst_49 = arith.constant 0.000000e+00 : f32
    %145 = vector.broadcast %cst_49 : f32 to vector<16x1xf32>
    %146 = arith.select %11, %70, %145 : vector<16x1xi1>, vector<16x1xf32>
    %147 = vector.shape_cast %146 : vector<16x1xf32> to vector<1x16x1xf32>
    %cst_50 = arith.constant dense<0.000000e+00> : vector<1xf32>
    %148 = vector.multi_reduction <add>, %147, %cst_50 [1, 2] : vector<1x16x1xf32> to vector<1xf32>
    %149 = vector.shape_cast %148 : vector<1xf32> to vector<1x1x1xf32>
    %150 = vector.extract %149[0, 0, 0] : f32 from vector<1x1x1xf32>
    %151 = vector.broadcast %150 : f32 to vector<1x1xf32>
    %cst_51 = arith.constant 0.000000e+00 : f32
    %152 = vector.broadcast %cst_51 : f32 to vector<16x1xf32>
    %153 = arith.select %11, %78, %152 : vector<16x1xi1>, vector<16x1xf32>
    %154 = vector.shape_cast %153 : vector<16x1xf32> to vector<1x16x1xf32>
    %cst_52 = arith.constant dense<0.000000e+00> : vector<1xf32>
    %155 = vector.multi_reduction <add>, %154, %cst_52 [1, 2] : vector<1x16x1xf32> to vector<1xf32>
    %156 = vector.shape_cast %155 : vector<1xf32> to vector<1x1x1xf32>
    %157 = vector.extract %156[0, 0, 0] : f32 from vector<1x1x1xf32>
    %158 = vector.broadcast %157 : f32 to vector<1x1xf32>
    %cst_53 = arith.constant 0xFF800000 : f32
    %159 = vector.broadcast %cst_53 : f32 to vector<16x1xf32>
    %160 = arith.select %11, %80, %159 : vector<16x1xi1>, vector<16x1xf32>
    %161 = vector.shape_cast %160 : vector<16x1xf32> to vector<1x16x1xf32>
    %cst_54 = arith.constant dense<0xFF800000> : vector<1xf32>
    %162 = vector.multi_reduction <maximumf>, %161, %cst_54 [1, 2] : vector<1x16x1xf32> to vector<1xf32>
    %163 = vector.shape_cast %162 : vector<1xf32> to vector<1x1x1xf32>
    %164 = vector.extract %163[0, 0, 0] : f32 from vector<1x1x1xf32>
    %165 = vector.broadcast %164 : f32 to vector<1x1xf32>
    %cst_55 = arith.constant 0x7F800000 : f32
    %166 = vector.broadcast %cst_55 : f32 to vector<16x1xf32>
    %167 = arith.select %11, %81, %166 : vector<16x1xi1>, vector<16x1xf32>
    %168 = vector.shape_cast %167 : vector<16x1xf32> to vector<1x16x1xf32>
    %cst_56 = arith.constant dense<0x7F800000> : vector<1xf32>
    %169 = vector.multi_reduction <minimumf>, %168, %cst_56 [1, 2] : vector<1x16x1xf32> to vector<1xf32>
    %170 = vector.shape_cast %169 : vector<1xf32> to vector<1x1x1xf32>
    %171 = vector.extract %170[0, 0, 0] : f32 from vector<1x1x1xf32>
    %172 = vector.broadcast %171 : f32 to vector<1x1xf32>
    %cst_57 = arith.constant 0.000000e+00 : f32
    %173 = vector.broadcast %cst_57 : f32 to vector<16x1xf32>
    %174 = arith.select %11, %59, %173 : vector<16x1xi1>, vector<16x1xf32>
    %175 = vector.shape_cast %174 : vector<16x1xf32> to vector<1x16x1xf32>
    %cst_58 = arith.constant dense<0.000000e+00> : vector<1xf32>
    %176 = vector.multi_reduction <add>, %175, %cst_58 [1, 2] : vector<1x16x1xf32> to vector<1xf32>
    %177 = vector.shape_cast %176 : vector<1xf32> to vector<1x1x1xf32>
    %178 = vector.extract %177[0, 0, 0] : f32 from vector<1x1x1xf32>
    %179 = vector.broadcast %178 : f32 to vector<1x1xf32>
    %180 = arith.mulf %59, %59 : vector<16x1xf32>
    %cst_59 = arith.constant 0.000000e+00 : f32
    %181 = vector.broadcast %cst_59 : f32 to vector<16x1xf32>
    %182 = arith.select %11, %180, %181 : vector<16x1xi1>, vector<16x1xf32>
    %183 = vector.shape_cast %182 : vector<16x1xf32> to vector<1x16x1xf32>
    %cst_60 = arith.constant dense<0.000000e+00> : vector<1xf32>
    %184 = vector.multi_reduction <add>, %183, %cst_60 [1, 2] : vector<1x16x1xf32> to vector<1xf32>
    %185 = vector.shape_cast %184 : vector<1xf32> to vector<1x1x1xf32>
    %186 = vector.extract %185[0, 0, 0] : f32 from vector<1x1x1xf32>
    %187 = vector.broadcast %186 : f32 to vector<1x1xf32>
    %cst_61 = arith.constant 0xFF800000 : f32
    %188 = vector.broadcast %cst_61 : f32 to vector<16x1xf32>
    %189 = arith.select %11, %59, %188 : vector<16x1xi1>, vector<16x1xf32>
    %190 = vector.shape_cast %189 : vector<16x1xf32> to vector<1x16x1xf32>
    %cst_62 = arith.constant dense<0xFF800000> : vector<1xf32>
    %191 = vector.multi_reduction <maximumf>, %190, %cst_62 [1, 2] : vector<1x16x1xf32> to vector<1xf32>
    %192 = vector.shape_cast %191 : vector<1xf32> to vector<1x1x1xf32>
    %193 = vector.extract %192[0, 0, 0] : f32 from vector<1x1x1xf32>
    %194 = vector.broadcast %193 : f32 to vector<1x1xf32>
    %cst_63 = arith.constant 0x7F800000 : f32
    %195 = vector.broadcast %cst_63 : f32 to vector<16x1xf32>
    %196 = arith.select %11, %59, %195 : vector<16x1xi1>, vector<16x1xf32>
    %197 = vector.shape_cast %196 : vector<16x1xf32> to vector<1x16x1xf32>
    %cst_64 = arith.constant dense<0x7F800000> : vector<1xf32>
    %198 = vector.multi_reduction <minimumf>, %197, %cst_64 [1, 2] : vector<1x16x1xf32> to vector<1xf32>
    %199 = vector.shape_cast %198 : vector<1xf32> to vector<1x1x1xf32>
    %200 = vector.extract %199[0, 0, 0] : f32 from vector<1x1x1xf32>
    %201 = vector.broadcast %200 : f32 to vector<1x1xf32>
    %202 = tpu.iota {dimensions = array<i32: 2>} : vector<1x1x128xi32>
    %cst_65 = arith.constant 0.000000e+00 : f32
    %203 = vector.broadcast %cst_65 : f32 to vector<1x1x128xf32>
    %c0_i32 = arith.constant 0 : i32
    %204 = vector.broadcast %c0_i32 : i32 to vector<1x1x128xi32>
    %205 = arith.cmpi eq, %202, %204 : vector<1x1x128xi32>
    %206 = vector.shape_cast %88 : vector<1x1xf32> to vector<1x1x1xf32>
    %207 = vector.broadcast %206 : vector<1x1x1xf32> to vector<1x1x128xf32>
    %208 = arith.select %205, %207, %203 : vector<1x1x128xi1>, vector<1x1x128xf32>
    %c1_i32 = arith.constant 1 : i32
    %209 = vector.broadcast %c1_i32 : i32 to vector<1x1x128xi32>
    %210 = arith.cmpi eq, %202, %209 : vector<1x1x128xi32>
    %211 = vector.shape_cast %95 : vector<1x1xf32> to vector<1x1x1xf32>
    %212 = vector.broadcast %211 : vector<1x1x1xf32> to vector<1x1x128xf32>
    %213 = arith.select %210, %212, %208 : vector<1x1x128xi1>, vector<1x1x128xf32>
    %c2_i32 = arith.constant 2 : i32
    %214 = vector.broadcast %c2_i32 : i32 to vector<1x1x128xi32>
    %215 = arith.cmpi eq, %202, %214 : vector<1x1x128xi32>
    %cst_66 = arith.constant 0.000000e+00 : f32
    %216 = vector.broadcast %cst_66 : f32 to vector<1x1x128xf32>
    %217 = arith.select %215, %216, %213 : vector<1x1x128xi1>, vector<1x1x128xf32>
    %c3_i32 = arith.constant 3 : i32
    %218 = vector.broadcast %c3_i32 : i32 to vector<1x1x128xi32>
    %219 = arith.cmpi eq, %202, %218 : vector<1x1x128xi32>
    %220 = vector.shape_cast %102 : vector<1x1xf32> to vector<1x1x1xf32>
    %221 = vector.broadcast %220 : vector<1x1x1xf32> to vector<1x1x128xf32>
    %222 = arith.select %219, %221, %217 : vector<1x1x128xi1>, vector<1x1x128xf32>
    %c4_i32 = arith.constant 4 : i32
    %223 = vector.broadcast %c4_i32 : i32 to vector<1x1x128xi32>
    %224 = arith.cmpi eq, %202, %223 : vector<1x1x128xi32>
    %225 = vector.shape_cast %109 : vector<1x1xf32> to vector<1x1x1xf32>
    %226 = vector.broadcast %225 : vector<1x1x1xf32> to vector<1x1x128xf32>
    %227 = arith.select %224, %226, %222 : vector<1x1x128xi1>, vector<1x1x128xf32>
    %c5_i32 = arith.constant 5 : i32
    %228 = vector.broadcast %c5_i32 : i32 to vector<1x1x128xi32>
    %229 = arith.cmpi eq, %202, %228 : vector<1x1x128xi32>
    %230 = vector.shape_cast %116 : vector<1x1xf32> to vector<1x1x1xf32>
    %231 = vector.broadcast %230 : vector<1x1x1xf32> to vector<1x1x128xf32>
    %232 = arith.select %229, %231, %227 : vector<1x1x128xi1>, vector<1x1x128xf32>
    %c6_i32 = arith.constant 6 : i32
    %233 = vector.broadcast %c6_i32 : i32 to vector<1x1x128xi32>
    %234 = arith.cmpi eq, %202, %233 : vector<1x1x128xi32>
    %cst_67 = arith.constant 1.000000e+00 : f32
    %235 = vector.broadcast %cst_67 : f32 to vector<1x1x128xf32>
    %236 = arith.select %234, %235, %232 : vector<1x1x128xi1>, vector<1x1x128xf32>
    %c7_i32 = arith.constant 7 : i32
    %237 = vector.broadcast %c7_i32 : i32 to vector<1x1x128xi32>
    %238 = arith.cmpi eq, %202, %237 : vector<1x1x128xi32>
    %239 = vector.shape_cast %123 : vector<1x1xf32> to vector<1x1x1xf32>
    %240 = vector.broadcast %239 : vector<1x1x1xf32> to vector<1x1x128xf32>
    %241 = arith.select %238, %240, %236 : vector<1x1x128xi1>, vector<1x1x128xf32>
    %c8_i32 = arith.constant 8 : i32
    %242 = vector.broadcast %c8_i32 : i32 to vector<1x1x128xi32>
    %243 = arith.cmpi eq, %202, %242 : vector<1x1x128xi32>
    %244 = vector.shape_cast %130 : vector<1x1xf32> to vector<1x1x1xf32>
    %245 = vector.broadcast %244 : vector<1x1x1xf32> to vector<1x1x128xf32>
    %246 = arith.select %243, %245, %241 : vector<1x1x128xi1>, vector<1x1x128xf32>
    %c9_i32 = arith.constant 9 : i32
    %247 = vector.broadcast %c9_i32 : i32 to vector<1x1x128xi32>
    %248 = arith.cmpi eq, %202, %247 : vector<1x1x128xi32>
    %249 = vector.shape_cast %137 : vector<1x1xf32> to vector<1x1x1xf32>
    %250 = vector.broadcast %249 : vector<1x1x1xf32> to vector<1x1x128xf32>
    %251 = arith.select %248, %250, %246 : vector<1x1x128xi1>, vector<1x1x128xf32>
    %c10_i32 = arith.constant 10 : i32
    %252 = vector.broadcast %c10_i32 : i32 to vector<1x1x128xi32>
    %253 = arith.cmpi eq, %202, %252 : vector<1x1x128xi32>
    %254 = vector.shape_cast %144 : vector<1x1xf32> to vector<1x1x1xf32>
    %255 = vector.broadcast %254 : vector<1x1x1xf32> to vector<1x1x128xf32>
    %256 = arith.select %253, %255, %251 : vector<1x1x128xi1>, vector<1x1x128xf32>
    %c11_i32 = arith.constant 11 : i32
    %257 = vector.broadcast %c11_i32 : i32 to vector<1x1x128xi32>
    %258 = arith.cmpi eq, %202, %257 : vector<1x1x128xi32>
    %cst_68 = arith.constant 0.000000e+00 : f32
    %259 = vector.broadcast %cst_68 : f32 to vector<1x1x128xf32>
    %260 = arith.select %258, %259, %256 : vector<1x1x128xi1>, vector<1x1x128xf32>
    %c12_i32 = arith.constant 12 : i32
    %261 = vector.broadcast %c12_i32 : i32 to vector<1x1x128xi32>
    %262 = arith.cmpi eq, %202, %261 : vector<1x1x128xi32>
    %263 = vector.shape_cast %151 : vector<1x1xf32> to vector<1x1x1xf32>
    %264 = vector.broadcast %263 : vector<1x1x1xf32> to vector<1x1x128xf32>
    %265 = arith.select %262, %264, %260 : vector<1x1x128xi1>, vector<1x1x128xf32>
    %c13_i32 = arith.constant 13 : i32
    %266 = vector.broadcast %c13_i32 : i32 to vector<1x1x128xi32>
    %267 = arith.cmpi eq, %202, %266 : vector<1x1x128xi32>
    %268 = vector.shape_cast %158 : vector<1x1xf32> to vector<1x1x1xf32>
    %269 = vector.broadcast %268 : vector<1x1x1xf32> to vector<1x1x128xf32>
    %270 = arith.select %267, %269, %265 : vector<1x1x128xi1>, vector<1x1x128xf32>
    %c14_i32 = arith.constant 14 : i32
    %271 = vector.broadcast %c14_i32 : i32 to vector<1x1x128xi32>
    %272 = arith.cmpi eq, %202, %271 : vector<1x1x128xi32>
    %273 = vector.shape_cast %165 : vector<1x1xf32> to vector<1x1x1xf32>
    %274 = vector.broadcast %273 : vector<1x1x1xf32> to vector<1x1x128xf32>
    %275 = arith.select %272, %274, %270 : vector<1x1x128xi1>, vector<1x1x128xf32>
    %c15_i32 = arith.constant 15 : i32
    %276 = vector.broadcast %c15_i32 : i32 to vector<1x1x128xi32>
    %277 = arith.cmpi eq, %202, %276 : vector<1x1x128xi32>
    %278 = vector.shape_cast %172 : vector<1x1xf32> to vector<1x1x1xf32>
    %279 = vector.broadcast %278 : vector<1x1x1xf32> to vector<1x1x128xf32>
    %280 = arith.select %277, %279, %275 : vector<1x1x128xi1>, vector<1x1x128xf32>
    %c16_i32_69 = arith.constant 16 : i32
    %281 = vector.broadcast %c16_i32_69 : i32 to vector<1x1x128xi32>
    %282 = arith.cmpi eq, %202, %281 : vector<1x1x128xi32>
    %283 = vector.shape_cast %179 : vector<1x1xf32> to vector<1x1x1xf32>
    %284 = vector.broadcast %283 : vector<1x1x1xf32> to vector<1x1x128xf32>
    %285 = arith.select %282, %284, %280 : vector<1x1x128xi1>, vector<1x1x128xf32>
    %c17_i32 = arith.constant 17 : i32
    %286 = vector.broadcast %c17_i32 : i32 to vector<1x1x128xi32>
    %287 = arith.cmpi eq, %202, %286 : vector<1x1x128xi32>
    %288 = vector.shape_cast %187 : vector<1x1xf32> to vector<1x1x1xf32>
    %289 = vector.broadcast %288 : vector<1x1x1xf32> to vector<1x1x128xf32>
    %290 = arith.select %287, %289, %285 : vector<1x1x128xi1>, vector<1x1x128xf32>
    %c18_i32 = arith.constant 18 : i32
    %291 = vector.broadcast %c18_i32 : i32 to vector<1x1x128xi32>
    %292 = arith.cmpi eq, %202, %291 : vector<1x1x128xi32>
    %293 = vector.shape_cast %194 : vector<1x1xf32> to vector<1x1x1xf32>
    %294 = vector.broadcast %293 : vector<1x1x1xf32> to vector<1x1x128xf32>
    %295 = arith.select %292, %294, %290 : vector<1x1x128xi1>, vector<1x1x128xf32>
    %c19_i32 = arith.constant 19 : i32
    %296 = vector.broadcast %c19_i32 : i32 to vector<1x1x128xi32>
    %297 = arith.cmpi eq, %202, %296 : vector<1x1x128xi32>
    %298 = vector.shape_cast %201 : vector<1x1xf32> to vector<1x1x1xf32>
    %299 = vector.broadcast %298 : vector<1x1x1xf32> to vector<1x1x128xf32>
    %300 = arith.select %297, %299, %295 : vector<1x1x128xi1>, vector<1x1x128xf32>
    %c0_70 = arith.constant 0 : index
    %c0_71 = arith.constant 0 : index
    %c0_72 = arith.constant 0 : index
    %301 = vector.load %arg5[%c0_70, %c0_71, %c0_72] : memref<1x1x128xf32, #tpu.memory_space<vmem>>, vector<1x1x128xf32>
    tpu.vector_store %arg5[%c0_70, %c0_71, %c0_72], %300 {strides = array<i32>} : memref<1x1x128xf32, #tpu.memory_space<vmem>>, vector<1x1x128xf32>,
    return
  }
  func.func @transform_0(%arg0: i32) -> (i32, i32) {
    %c0_i32 = arith.constant 0 : i32
    %c0_i32_0 = arith.constant 0 : i32
    return %arg0, %c0_i32 : i32, i32
  }
  func.func @transform_1(%arg0: i32) -> (i32, i32) {
    %c0_i32 = arith.constant 0 : i32
    %c0_i32_0 = arith.constant 0 : i32
    %c0_i32_1 = arith.constant 0 : i32
    return %c0_i32, %c0_i32_0 : i32, i32
  }
  func.func @transform_2(%arg0: i32) -> (i32, i32) {
    %c0_i32 = arith.constant 0 : i32
    %c0_i32_0 = arith.constant 0 : i32
    return %arg0, %c0_i32 : i32, i32
  }
  func.func @transform_3(%arg0: i32) -> (i32, i32) {
    %c0_i32 = arith.constant 0 : i32
    %c0_i32_0 = arith.constant 0 : i32
    %c0_i32_1 = arith.constant 0 : i32
    return %c0_i32, %c0_i32_0 : i32, i32
  }
  func.func @transform_4(%arg0: i32) -> (i32, i32, i32) {
    %c0_i32 = arith.constant 0 : i32
    %c0_i32_0 = arith.constant 0 : i32
    %c0_i32_1 = arith.constant 0 : i32
    return %arg0, %c0_i32, %c0_i32_0 : i32, i32, i32
  }
}

</mosaic_0001>

<bundles_post_ra>
// kernel: tpu_custom_call.1
= control target key start
LH: loop header
LB: loop body
LE: loop exit
PB: predicated region body
PF: predicated region fallthrough
CT: control target
= control target key end

     0   :  { %v707_v2 = vmov 0   ;;  %s990_s0 = inlined_call_operand.vmem [shape: bf16[16,128], index: 0, kind: input, shape index: {}]   ;;  %s991_s1 = inlined_call_operand.vmem [shape: bf16[128,16], index: 1, kind: input, shape index: {}]   ;;  %s992_s2 = inlined_call_operand.vmem [shape: s32[16,1], index: 2, kind: input, shape index: {}]   ;;  %s993_s3 = inlined_call_operand.vmem [shape: s32[1,16], index: 3, kind: input, shape index: {}]   ;;  %s994_s4 = inlined_call_operand.hbm [shape: f32[1,1,128], index: 4, kind: output, shape index: {}]  }
   0x1   :  { %v619_v0 = vld [vmem:[%s991_s1 + $0x38] sm:$0xff]  ;;  %v618_v1 = vld [vmem:[%s991_s1 + $0x30] sm:$0xff]  ;;  %658 = vset.pattern.permute.xlu1 %v707_v2  ;;  %v117_v3 = vld [vmem:[%s992_s2] sm:$0xff]  ;;  %659 = vset.pattern.permute.xlu0 %v707_v2 }
   0x2   :  { %90 = vmatpush.bf16.msra.mxu0 %v619_v0  ;;  %121 = vperm.xlu1 %658, %v117_v3  }
   0x3   :  { %9 = vsyncpa [#allocation3], 0  ;;  %v617_v4 = vld [vmem:[%s991_s1 + $0x28] sm:$0xff]  ;;  %v616_v6 = vld [vmem:[%s991_s1 + $0x20] sm:$0xff]  ;;  %v105_v14 = vlaneseq  ;;  %vm708_vm2 = vmmov 1   ;;  %vm133_vm6 = vcmask 130048  }
   0x4   :  { %v118_v5 = vld [vmem:[%s992_s2 + $0x8] sm:$0xff]  ;;  %v615_v7 = vld [vmem:[%s991_s1 + $0x18] sm:$0xff]  ;;  %v614_v8 = vld [vmem:[%s991_s1 + $0x10] sm:$0xff]  ;;  %v709_v19 = vmov 0.0   ;;  %vm290_vm10 = vcmask 7168   ;;  %s566_s25 = sshll.u32 %s994_s4, 4  ;;  %s567_s25 = int_to_ptr.hbm [resolvable:$true] %s566_s25 }
   0x5   :  { %v613_v9 = vld [vmem:[%s991_s1 + $0x8] sm:$0xff]  ;;  %v612_v10 = vld [vmem:[%s991_s1] sm:$0xff]  ;;  %v772_v15 = vshrl.u32 %v105_v14, 7  ;;  %v774_v16 = vand.u32 127, %v105_v14  ;;  %s710_s27 = smov [#allocation2]  }
   0x6   :  { %91 = vmatpush.bf16.msra.mxu0 %v618_v1  ;;  %v611_v11 = vld [vmem:[%s990_s0] sm:$0xff]  ;;  %s564_s28 = sshll.u32 %s710_s27, 4  ;;  %s565_s28 = int_to_ptr.vmem [resolvable:$true] %s564_s28 }
   0x7   :  { %v660_v12 = vld [vmem:[%s993_s3] ss:$0 sm:$0xff]  ;;  %vm113_vm1 = vcmp.eq.s32.totalorder %v774_v16, %v772_v15  ;;  %v779_v17 = vadd.s32 8, %v772_v15 }
   0x8   :  { %vm129_vm3 = vmxor %vm113_vm1, %vm708_vm2 }
   0x9   :  { %vm114_vm5 = vcmp.eq.s32.totalorder %v774_v16, %v779_v17 }
   0xa   :  { %92 = vmatpush.bf16.msra.mxu0 %v617_v4  ;;  %124 = vperm.xlu1 %658, %v118_v5   ;;  %vm130_vm7 = vmxor %vm114_vm5, %vm708_vm2 }
   0xe   :  { %93 = vmatpush.bf16.msra.mxu0 %v616_v6 }
  0x12   :  { %94 = vmatpush.bf16.msra.mxu0 %v615_v7 }
  0x16   :  { %95 = vmatpush.bf16.msra.mxu0 %v614_v8 }
  0x1a   :  { %96 = vmatpush.bf16.msra.mxu0 %v613_v9 }
  0x1e   :  { %97 = vmatpush.bf16.msra.mxu0 %v612_v10 }
  0x21   :  { %98 = vmatmul.bf16.vlgmr.msra.gmra.mxu0 %v611_v11 }
  0x74   :  { %v122_v13 = vpop.permute.xlu1 %121 }
  0x75   :  { %vm127_vm0 = vcmp.eq.s32.totalorder %v122_v13, %v660_v12 }
  0x76   :  { %vm784_vm4 = vmand %vm127_vm0, %vm129_vm3 }
  0x77   :  { %v190_v20 = vsel %vm784_vm4, 1.0, %v709_v19 }
  0x78   :  { %v192_v21 = vsel %vm133_vm6, %v190_v20, 0.0 }
  0x79   :  { %193 = vadd.xlane.f32.xlu2 %v192_v21 }
  0x7c   :  { %v125_v22 = vpop.permute.xlu1 %124 }
  0x7d   :  { %vm128_vm8 = vcmp.eq.s32.totalorder %v125_v22, %v660_v12 }
  0x7e   :  { %vm796_vm9 = vmand %vm128_vm8, %vm130_vm7  ;;  %vm507_vm7 = vcmp.eq.s32.totalorder %v774_v16, 2  ;;  %vm509_vm8 = vcmp.eq.s32.totalorder %v774_v16, 3 }
  0x7f   :  { %v191_v24 = vsel %vm796_vm9, 1.0, %v709_v19 }
  0x80   :  { %v195_v25 = vsel %vm133_vm6, %v191_v24, 0.0 }
  0x81   :  { %196 = vadd.xlane.f32.xlu2 %v195_v25 }
  0x9e   :  { %v99_v26 = vpop.f32.mrf.mxu0 }
  0x9f   :  { %v134_v27 = vsel %vm133_vm6, %v99_v26, -inf }
  0xa0   :  { %135 = vmax.xlane.f32.xlu0 %v134_v27 }
  0xa6   :  { %v101_v28 = vpop.f32.mrf.mxu0 }
  0xa7   :  { %v137_v29 = vsel %vm133_vm6, %v101_v28, -inf }
  0xa8   :  { %138 = vmax.xlane.f32.xlu0 %v137_v29 }
  0xec   :  { %v837_v0 = vpop.xlane.xlu2 %193 }
  0xed   :  { %v842_v4 = vmax.f32 %v837_v0, 1.0  ;;  %vm206_vm3 = vcmp.gt.f32.partialorder %v837_v0, 0.0 }
  0xef   :  { %vm219_vm11 = vweird.f32 %v842_v4 }
  0xf4   :  { %v839_v1 = vpop.xlane.xlu2 %196 }
  0xf5   :  { %v845_v5 = vmax.f32 %v839_v1, 1.0 }
  0xf7   :  { %vm234_vm14 = vweird.f32 %v845_v5 }
 0x113   :  { %v136_v30 = vpop.xlane.xlu0 %135 }
 0x114   :  { %v140_v31 = vsub.f32 %v99_v26, %v136_v30 }
 0x116   :  { %v142_v32 = vmul.f32 1.442695, %v140_v31  ;;  %v246_v41 = vsel %vm133_vm6, %v140_v31, 0.0  ;;  %v252_v45 = vmul.f32 %v140_v31, %v140_v31  ;;  %v198_v53 = vsel %vm784_vm4, %v140_v31, 0.0 }
 0x117   :  { %v200_v55 = vsel %vm133_vm6, %v198_v53, 0.0  ;;  %v260_v58 = vsel %vm133_vm6, %v140_v31, inf  ;;  %v174_v61 = vsel %vm113_vm1, -inf, %v140_v31  ;;  %vm207_vm4 = vcmp.gt.f32.partialorder %v839_v1, 0.0 }
 0x118   :  { %661 = vpow2.f32 %v142_v32  ;;  %v254_v46 = vsel %vm133_vm6, %v252_v45, 0.0  ;;  %v176_v63 = vsel %vm133_vm6, %v174_v61, -inf }
 0x11b   :  { %v139_v33 = vpop.xlane.xlu0 %138 }
 0x11c   :  { %v141_v34 = vsub.f32 %v101_v28, %v139_v33 }
 0x11e   :  { %v662_v35 = vpop.eup %661  ;;  %v144_v36 = vmul.f32 1.442695, %v141_v34  ;;  %v249_v47 = vsel %vm133_vm6, %v141_v34, 0.0  ;;  %v263_v48 = vsel %vm133_vm6, %v141_v34, inf  ;;  %v253_v50 = vmul.f32 %v141_v34, %v141_v34 }
 0x11f   :  { %v154_v37 = vsel %vm133_vm6, %v662_v35, 0.0  ;;  %v146_v38 = vsel %vm113_vm1, %v662_v35, 0.0  ;;  %v160_v49 = vmul.f32 %v662_v35, %v662_v35  ;;  %v199_v57 = vsel %vm796_vm9, %v141_v34, 0.0 }
 0x120   :  { %155 = vadd.xlane.f32.xlu2 %v154_v37  ;;  %v148_v39 = vsel %vm133_vm6, %v146_v38, 0.0  ;;  %663 = vpow2.f32 %v144_v36  ;;  %v257_v52 = vsel %vm133_vm6, %v253_v50, 0.0  ;;  %v203_v59 = vsel %vm133_vm6, %v199_v57, 0.0 }
 0x121   :  { %149 = vadd.xlane.f32.xlu0 %v148_v39  ;;  %v162_v51 = vsel %vm133_vm6, %v160_v49, 0.0  ;;  %v175_v60 = vsel %vm114_vm5, -inf, %v141_v34  ;;  %665 = vrcp.f32 %v842_v4  ;;  %v240_v49 = vand.u32 2147483648, %v845_v5 }
 0x122   :  { %v179_v62 = vsel %vm133_vm6, %v175_v60, -inf  ;;  %667 = vrcp.f32 %v845_v5  ;;  %vm512_vm9 = vcmp.eq.s32.totalorder %v774_v16, 4 }
 0x126   :  { %v664_v40 = vpop.eup %663 }
 0x127   :  { %v157_v42 = vsel %vm133_vm6, %v664_v40, 0.0  ;;  %v147_v43 = vsel %vm114_vm5, %v664_v40, 0.0  ;;  %v161_v54 = vmul.f32 %v664_v40, %v664_v40  ;;  %v856_v14 = vpop.eup %665  ;;  %v225_v40 = vand.u32 2147483648, %v842_v4 }
 0x128   :  { %247 = vadd.xlane.f32.xlu2 %v246_v41  ;;  %v151_v44 = vsel %vm133_vm6, %v147_v43, 0.0  ;;  %v858_v15 = vpop.eup %667  ;;  %v215_v18 = vmul.f32 %v856_v14, %v842_v4  ;;  %vm220_vm12 = vweird.f32 %v856_v14  ;;  %vm501_vm5 = vcmp.eq.s32.totalorder %v774_v16, 0 }
 0x129   :  { %158 = vadd.xlane.f32.xlu0 %v157_v42  ;;  %152 = vadd.xlane.f32.xlu1 %v151_v44  ;;  %v165_v56 = vsel %vm133_vm6, %v161_v54, 0.0  ;;  %v230_v25 = vmul.f32 %v858_v15, %v845_v5  ;;  %vm892_vm13 = vmor %vm219_vm11, %vm220_vm12  ;;  %vm235_vm15 = vweird.f32 %v858_v15  ;;  %vm504_vm6 = vcmp.eq.s32.totalorder %v774_v16, 1 }
 0x12a   :  { %v216_v28 = vsub.f32 1.0, %v215_v18  ;;  %vm929_vm1 = vmor %vm234_vm14, %vm235_vm15  ;;  %vm518_vm11 = vcmp.eq.s32.totalorder %v774_v16, 6  ;;  %vm520_vm12 = vcmp.eq.s32.totalorder %v774_v16, 7  ;;  %vm526_vm14 = vcmp.eq.s32.totalorder %v774_v16, 9 }
 0x12b   :  { %v231_v29 = vsub.f32 1.0, %v230_v25  ;;  %vm529_vm15 = vcmp.eq.s32.totalorder %v774_v16, 10 }
 0x12c   :  { %v217_v32 = vmul.f32 %v856_v14, %v216_v28 }
 0x12d   :  { %v232_v41 = vmul.f32 %v858_v15, %v231_v29 }
 0x12e   :  { %v218_v43 = vadd.f32 %v856_v14, %v217_v32 }
 0x130   :  { %255 = vadd.xlane.f32.xlu2 %v254_v46 }
 0x131   :  { %250 = vadd.xlane.f32.xlu0 %v249_v47  ;;  %264 = vmin.xlane.f32.xlu1 %v263_v48  ;;  %v223_v48 = vand.u32 2147483647, %v842_v4 }
 0x133   :  { %vm912_vm0 = vcmp.eq.f32.partialorder %v223_v48, 8.507059e+37 }
 0x138   :  { %163 = vadd.xlane.f32.xlu2 %v162_v51  ;;  %v226_v51 = vor.u32 1.1754944e-38, %v225_v40 }
 0x139   :  { %258 = vadd.xlane.f32.xlu0 %v257_v52  ;;  %v233_v52 = vadd.f32 %v858_v15, %v232_v41 }
 0x13b   :  { %v237_v28 = vsel %vm929_vm1, %v858_v15, %v233_v52  ;;  %vm534_vm1 = vcmp.eq.s32.totalorder %v774_v16, 12 }
 0x140   :  { %201 = vadd.xlane.f32.xlu2 %v200_v55  ;;  %v222_v55 = vsel %vm892_vm13, %v856_v14, %v218_v43  ;;  %v238_v14 = vand.u32 2147483647, %v845_v5  ;;  %v241_v5 = vor.u32 1.1754944e-38, %v240_v49  ;;  %vm523_vm13 = vcmp.eq.s32.totalorder %v774_v16, 8 }
 0x141   :  { %166 = vadd.xlane.f32.xlu0 %v165_v56 }
 0x142   :  { %vm239_vm2 = vcmp.eq.f32.partialorder %v238_v14, 8.507059e+37 }
 0x143   :  { %v242_v41 = vsel %vm239_vm2, %v241_v5, %v237_v28  ;;  %vm537_vm2 = vcmp.eq.s32.totalorder %v774_v16, 13 }
 0x148   :  { %261 = vmin.xlane.f32.xlu2 %v260_v58 }
 0x149   :  { %204 = vadd.xlane.f32.xlu0 %v203_v59 }
 0x150   :  { %180 = vmax.xlane.f32.xlu2 %v179_v62 }
 0x151   :  { %177 = vmax.xlane.f32.xlu0 %v176_v63 }
 0x193   :  { %v156_v2 = vpop.xlane.xlu2 %155 }
 0x194   :  { %v150_v3 = vpop.xlane.xlu0 %149  ;;  %v329_v10 = vsel %vm290_vm10, %v156_v2, 0.0 }
 0x195   :  { %v847_v6 = vsub.f32 %v156_v2, %v150_v3  ;;  %v170_v50 = vmul.f32 %v150_v3, %v150_v3 }
 0x197   :  { %669 = vlog2.f32 %v847_v6  ;;  %v367_v3 = vsel %vm290_vm10, %v847_v6, 0.0 }
 0x19b   :  { %v851_v7 = vpop.xlane.xlu2 %247 }
 0x19c   :  { %v153_v8 = vpop.xlane.xlu1 %152  ;;  %v159_v9 = vpop.xlane.xlu0 %158  ;;  %v291_v23 = vsel %vm290_vm10, %v851_v7, 0.0 }
 0x19d   :  { %v169_v11 = vsub.f32 %v159_v9, %v153_v8  ;;  %v330_v12 = vsel %vm290_vm10, %v159_v9, 0.0  ;;  %v670_v17 = vpop.eup %669  ;;  %v171_v54 = vmul.f32 %v153_v8, %v153_v8 }
 0x19e   :  { %v331_v13 = vadd.f32 %v330_v12, %v329_v10  ;;  %v866_v22 = vmul.f32 0.6931472, %v670_v17 }
 0x19f   :  { %671 = vlog2.f32 %v169_v11  ;;  %v368_v60 = vsel %vm290_vm10, %v169_v11, 0.0 }
 0x1a0   :  { %332 = vadd.xlane.f32.xlu2 %v331_v13  ;;  %v284_v30 = vsub.f32 0.0, %v866_v22  ;;  %v274_v36 = vmul.f32 2.0, %v866_v22  ;;  %v270_v53 = vmul.f32 16.0, %v866_v22  ;;  %v208_v59 = vmul.f32 %v837_v0, %v866_v22 }
 0x1a1   :  { %v369_v12 = vadd.f32 %v368_v60, %v367_v3 }
 0x1a2   :  { %v276_v46 = vmul.f32 %v274_v36, %v851_v7  ;;  %v280_v11 = vmul.f32 %v270_v53, %v866_v22 }
 0x1a3   :  { %v862_v19 = vpop.xlane.xlu2 %255 }
 0x1a4   :  { %v864_v20 = vpop.xlane.xlu0 %250  ;;  %v305_v38 = vsel %vm290_vm10, %v862_v19, 0.0  ;;  %v278_v61 = vsub.f32 %v862_v19, %v276_v46  ;;  %v265_v29 = vpop.xlane.xlu1 %264 }
 0x1a5   :  { %v672_v21 = vpop.eup %671  ;;  %v292_v24 = vsel %vm290_vm10, %v864_v20, 0.0 }
 0x1a6   :  { %v874_v26 = vmul.f32 0.6931472, %v672_v21  ;;  %v293_v27 = vadd.f32 %v292_v24, %v291_v23  ;;  %v227_v23 = vsel %vm912_vm0, %v226_v51, %v222_v55  ;;  %v282_v25 = vadd.f32 %v280_v11, %v278_v61 }
 0x1a7   :  { %vm532_vm0 = vcmp.eq.s32.totalorder %v774_v16, 11 }
 0x1a8   :  { %294 = vadd.xlane.f32.xlu1 %v293_v27  ;;  %v285_v31 = vsub.f32 0.0, %v874_v26  ;;  %v275_v33 = vmul.f32 2.0, %v874_v26  ;;  %v271_v47 = vmul.f32 16.0, %v874_v26 }
 0x1aa   :  { %v880_v35 = vmax.f32 %v284_v30, %v285_v31  ;;  %v277_v44 = vmul.f32 %v275_v33, %v864_v20  ;;  %v281_v62 = vmul.f32 %v271_v47, %v874_v26  ;;  %v273_v17 = vsub.f32 %v864_v20, %v271_v47 }
 0x1ab   :  { %v164_v34 = vpop.xlane.xlu2 %163  ;;  %v272_v20 = vsub.f32 %v851_v7, %v270_v53  ;;  %v209_v31 = vmul.f32 %v839_v1, %v874_v26  ;;  %v287_v7 = vsub.f32 %v265_v29, %v874_v26  ;;  %v268_v53 = vmul.f32 1.442695, %v265_v29 }
 0x1ac   :  { %v259_v37 = vpop.xlane.xlu0 %258  ;;  %v172_v56 = vsub.f32 %v164_v34, %v170_v50  ;;  %v343_v4 = vsel %vm290_vm10, %v164_v34, 0.0  ;;  %v406_v33 = vsel %vm290_vm10, %v273_v17, 0.0 }
 0x1ad   :  { %v306_v39 = vsel %vm290_vm10, %v259_v37, 0.0  ;;  %v279_v57 = vsub.f32 %v259_v37, %v277_v44  ;;  %673 = vpow2.f32 %v268_v53 }
 0x1ae   :  { %v307_v42 = vadd.f32 %v306_v39, %v305_v38  ;;  %v381_v19 = vsel %vm290_vm10, %v172_v56, 0.0  ;;  %v419_v38 = vsel %vm290_vm10, %v282_v25, 0.0  ;;  %v405_v39 = vsel %vm290_vm10, %v272_v20, 0.0 }
 0x1af   :  { %v283_v18 = vadd.f32 %v281_v62, %v279_v57  ;;  %v407_v43 = vadd.f32 %v406_v33, %v405_v39 }
 0x1b0   :  { %308 = vadd.xlane.f32.xlu0 %v307_v42 }
 0x1b1   :  { %v420_v32 = vsel %vm290_vm10, %v283_v18, 0.0 }
 0x1b2   :  { %v421_v42 = vadd.f32 %v420_v32, %v419_v38 }
 0x1b3   :  { %v202_v58 = vpop.xlane.xlu2 %201  ;;  %v674_v60 = vpop.eup %673 }
 0x1b4   :  { %v167_v2 = vpop.xlane.xlu0 %166  ;;  %v210_v8 = vsub.f32 %v202_v58, %v208_v59 }
 0x1b5   :  { %v173_v9 = vsub.f32 %v167_v2, %v171_v54  ;;  %v344_v10 = vsel %vm290_vm10, %v167_v2, 0.0 }
 0x1b6   :  { %v345_v13 = vadd.f32 %v344_v10, %v343_v4  ;;  %v228_v27 = vmul.f32 %v227_v23, %v210_v8 }
 0x1b7   :  { %v382_v21 = vsel %vm290_vm10, %v173_v9, 0.0 }
 0x1b8   :  { %370 = vadd.xlane.f32.xlu0 %v369_v12  ;;  %346 = vadd.xlane.f32.xlu1 %v345_v13  ;;  %v383_v24 = vadd.f32 %v382_v21, %v381_v19  ;;  %v244_v37 = vsel %vm206_vm3, %v228_v27, 0.0  ;;  %vm540_vm3 = vcmp.eq.s32.totalorder %v774_v16, 14 }
 0x1b9   :  { %v465_v0 = vmul.f32 %v244_v37, %v244_v37 }
 0x1ba   :  { %384 = vadd.xlane.f32.xlu2 %v383_v24 }
 0x1bb   :  { %v262_v30 = vpop.xlane.xlu2 %261  ;;  %v469_v50 = vsel %vm290_vm10, %v465_v0, 0.0 }
 0x1bc   :  { %v286_v34 = vsub.f32 %v262_v30, %v866_v22  ;;  %v205_v36 = vpop.xlane.xlu0 %204  ;;  %v453_v22 = vsel %vm290_vm10, %v244_v37, 0.0  ;;  %v266_v55 = vmul.f32 1.442695, %v262_v30  ;;  %v319_v58 = vmin.f32 %v262_v30, %v265_v29 }
 0x1bd   :  { %v211_v15 = vsub.f32 %v205_v36, %v209_v31 }
 0x1be   :  { %v948_v40 = vmin.f32 %v286_v34, %v287_v7  ;;  %675 = vpow2.f32 %v266_v55  ;;  %v320_v61 = vrot.slane %v319_v58, 4 }
 0x1bf   :  { %v243_v44 = vmul.f32 %v242_v41, %v211_v15 }
 0x1c0   :  { %422 = vadd.xlane.f32.xlu0 %v421_v42  ;;  %408 = vadd.xlane.f32.xlu1 %v407_v43  ;;  %v321_v10 = vmin.f32 %v319_v58, %v320_v61 }
 0x1c1   :  { %v245_v26 = vsel %vm207_vm4, %v243_v44, 0.0  ;;  %v444_v44 = vrot.slane %v948_v40, 4  ;;  %vm543_vm4 = vcmp.eq.s32.totalorder %v774_v16, 15 }
 0x1c2   :  { %v454_v45 = vsel %vm290_vm10, %v245_v26, 0.0  ;;  %v466_v46 = vmul.f32 %v245_v26, %v245_v26  ;;  %v953_v48 = vmax.f32 %v244_v37, %v245_v26  ;;  %v955_v49 = vmin.f32 %v244_v37, %v245_v26 }
 0x1c3   :  { %v455_v47 = vadd.f32 %v454_v45, %v453_v22  ;;  %v181_v52 = vpop.xlane.xlu2 %180  ;;  %v322_v19 = vrot.slane %v321_v10, 2  ;;  %v434_v37 = vrot.slane %v880_v35, 4  ;;  %v445_v55 = vmin.f32 %v948_v40, %v444_v44 }
 0x1c4   :  { %v470_v51 = vsel %vm290_vm10, %v466_v46, 0.0  ;;  %v178_v54 = vpop.xlane.xlu0 %177  ;;  %v184_v56 = vmul.f32 1.442695, %v181_v52  ;;  %v676_v63 = vpop.eup %675  ;;  %vm515_vm10 = vcmp.eq.s32.totalorder %v774_v16, 5 }
 0x1c5   :  { %456 = vadd.xlane.f32.xlu2 %v455_v47  ;;  %v471_v1 = vadd.f32 %v470_v51, %v469_v50  ;;  %v182_v57 = vmul.f32 1.442695, %v178_v54  ;;  %v357_v11 = vmin.f32 %v676_v63, %v674_v60  ;;  %v323_v28 = vmin.f32 %v321_v10, %v322_v19 }
 0x1c6   :  { %677 = vpow2.f32 %v184_v56  ;;  %v435_v50 = vmax.f32 %v880_v35, %v434_v37  ;;  %v484_v63 = vrot.slane %v953_v48, 4  ;;  %v494_v35 = vrot.slane %v955_v49, 4 }
 0x1c7   :  { %679 = vpow2.f32 %v182_v57  ;;  %v358_v21 = vrot.slane %v357_v11, 4  ;;  %v324_v34 = vrot.slane %v323_v28, 1 }
 0x1c8   :  { %472 = vadd.xlane.f32.xlu1 %v471_v1 }
 0x1c9   :  { %v359_v5 = vmin.f32 %v357_v11, %v358_v21  ;;  %v325_v46 = vmin.f32 %v323_v28, %v324_v34  ;;  %v446_v11 = vrot.slane %v445_v55, 2  ;;  %v485_v21 = vmax.f32 %v953_v48, %v484_v63 }
 0x1cb   :  { %v360_v36 = vrot.slane %v359_v5, 2  ;;  %v447_v28 = vmin.f32 %v445_v55, %v446_v11 }
 0x1cc   :  { %v678_v4 = vpop.eup %677 }
 0x1cd   :  { %v680_v8 = vpop.eup %679  ;;  %v361_v47 = vmin.f32 %v359_v5, %v360_v36 }
 0x1ce   :  { %v395_v14 = vmax.f32 %v680_v8, %v678_v4 }
 0x1cf   :  { %v362_v61 = vrot.slane %v361_v47, 1 }
 0x1d0   :  { %v396_v20 = vrot.slane %v395_v14, 4 }
 0x1d2   :  { %v397_v31 = vmax.f32 %v395_v14, %v396_v20  ;;  %v495_v20 = vmin.f32 %v955_v49, %v494_v35  ;;  %v448_v49 = vrot.slane %v447_v28, 1 }
 0x1d4   :  { %v398_v43 = vrot.slane %v397_v31, 2  ;;  %v496_v37 = vrot.slane %v495_v20, 2 }
 0x1d6   :  { %v399_v54 = vmax.f32 %v397_v31, %v398_v43 }
 0x1d8   :  { %v400_v10 = vrot.slane %v399_v54, 1 }
 0x213   :  { %v333_v59 = vpop.xlane.xlu2 %332 }
 0x214   :  { %v334_v2 = vrot.slane %v333_v59, 4 }
 0x216   :  { %v335_v12 = vadd.f32 %v334_v2, %v333_v59 }
 0x218   :  { %v336_v6 = vrot.slane %v335_v12, 2 }
 0x21a   :  { %v337_v30 = vadd.f32 %v336_v6, %v335_v12 }
 0x21b   :  { %v295_v62 = vpop.xlane.xlu1 %294 }
 0x21c   :  { %v296_v3 = vrot.slane %v295_v62, 4  ;;  %v338_v41 = vrot.slane %v337_v30, 1 }
 0x21e   :  { %v297_v9 = vadd.f32 %v296_v3, %v295_v62  ;;  %v339_v53 = vadd.f32 %v338_v41, %v337_v30  ;;  %v436_v62 = vrot.slane %v435_v50, 2 }
 0x220   :  { %v298_v13 = vrot.slane %v297_v9, 2  ;;  %v437_v19 = vmax.f32 %v435_v50, %v436_v62 }
 0x222   :  { %v299_v17 = vadd.f32 %v298_v13, %v297_v9 }
 0x223   :  { %v309_v18 = vpop.xlane.xlu0 %308 }
 0x224   :  { %v310_v23 = vrot.slane %v309_v18, 4  ;;  %v300_v24 = vrot.slane %v299_v17, 1 }
 0x226   :  { %v311_v25 = vadd.f32 %v310_v23, %v309_v18  ;;  %v301_v27 = vadd.f32 %v300_v24, %v299_v17  ;;  %v363_v17 = vmin.f32 %v361_v47, %v362_v61 }
 0x228   :  { %v312_v29 = vrot.slane %v311_v25, 2  ;;  %620 = vpush %v301_v27 }
 0x22a   :  { %v313_v32 = vadd.f32 %v312_v29, %v311_v25  ;;  %v401_v29 = vmax.f32 %v399_v54, %v400_v10 }
 0x22b   :  { %v347_v33 = vpop.xlane.xlu1 %346  ;;  %v371_v7 = vpop.xlane.xlu0 %370 }
 0x22c   :  { %v348_v15 = vrot.slane %v347_v33, 4  ;;  %v372_v38 = vrot.slane %v371_v7, 4  ;;  %v314_v39 = vrot.slane %v313_v32, 1 }
 0x22d   :  { %v385_v42 = vpop.xlane.xlu2 %384 }
 0x22e   :  { %v349_v0 = vadd.f32 %v348_v15, %v347_v33  ;;  %v373_v26 = vadd.f32 %v372_v38, %v371_v7  ;;  %v386_v22 = vrot.slane %v385_v42, 4  ;;  %v315_v45 = vadd.f32 %v314_v39, %v313_v32 }
 0x22f   :  { %v438_v33 = vrot.slane %v437_v19, 1  ;;  %v486_v7 = vrot.slane %v485_v21, 2 }
 0x230   :  { %v350_v51 = vrot.slane %v349_v0, 2  ;;  %v374_v1 = vrot.slane %v373_v26, 2  ;;  %v387_v52 = vadd.f32 %v386_v22, %v385_v42  ;;  %622 = vpush %v315_v45  ;;  %v449_v22 = vmin.f32 %v447_v28, %v448_v49 }
 0x231   :  { %624 = vpush %v325_v46  ;;  %v487_v43 = vmax.f32 %v485_v21, %v486_v7 }
 0x232   :  { %v388_v56 = vrot.slane %v387_v52, 2  ;;  %626 = vpush %v339_v53  ;;  %v351_v57 = vadd.f32 %v350_v51, %v349_v0  ;;  %v375_v58 = vadd.f32 %v374_v1, %v373_v26  ;;  %v439_v0 = vmax.f32 %v437_v19, %v438_v33 }
 0x233   :  { %v409_v59 = vpop.xlane.xlu1 %408  ;;  %v423_v60 = vpop.xlane.xlu0 %422  ;;  %v497_v26 = vmin.f32 %v495_v20, %v496_v37  ;;  %v488_v50 = vrot.slane %v487_v43, 1 }
 0x234   :  { %v410_v2 = vrot.slane %v409_v59, 4  ;;  %v424_v3 = vrot.slane %v423_v60, 4  ;;  %v352_v4 = vrot.slane %v351_v57, 1  ;;  %v376_v8 = vrot.slane %v375_v58, 1 }
 0x235   :  { %v389_v9 = vadd.f32 %v388_v56, %v387_v52  ;;  %v498_v1 = vrot.slane %v497_v26, 1  ;;  %v489_v53 = vmax.f32 %v487_v43, %v488_v50 }
 0x236   :  { %v411_v40 = vadd.f32 %v410_v2, %v409_v59  ;;  %v425_v12 = vadd.f32 %v424_v3, %v423_v60  ;;  %v353_v13 = vadd.f32 %v352_v4, %v351_v57  ;;  %v377_v14 = vadd.f32 %v376_v8, %v375_v58 }
 0x237   :  { %v390_v18 = vrot.slane %v389_v9, 1  ;;  %v499_v54 = vmin.f32 %v497_v26, %v498_v1 }
 0x238   :  { %v412_v6 = vrot.slane %v411_v40, 2  ;;  %v426_v23 = vrot.slane %v425_v12, 2  ;;  %v457_v24 = vpop.xlane.xlu2 %456  ;;  %628 = vpush %v353_v13 }
 0x239   :  { %v458_v25 = vrot.slane %v457_v24, 4  ;;  %630 = vpush %v363_v17  ;;  %v391_v27 = vadd.f32 %v390_v18, %v389_v9 }
 0x23a   :  { %v427_v5 = vadd.f32 %v426_v23, %v425_v12  ;;  %632 = vpush %v377_v14  ;;  %v413_v30 = vadd.f32 %v412_v6, %v411_v40 }
 0x23b   :  { %v459_v31 = vadd.f32 %v458_v25, %v457_v24  ;;  %634 = vpush %v391_v27  ;;  %v473_v32 = vpop.xlane.xlu1 %472 }
 0x23c   :  { %636 = vpush %v401_v29  ;;  %v474_v48 = vrot.slane %v473_v32, 4  ;;  %v414_v34 = vrot.slane %v413_v30, 1  ;;  %v428_v36 = vrot.slane %v427_v5, 1 }
 0x23d   :  { %v460_v15 = vrot.slane %v459_v31, 2 }
 0x23e   :  { %v475_v38 = vadd.f32 %v474_v48, %v473_v32  ;;  %v415_v39 = vadd.f32 %v414_v34, %v413_v30  ;;  %v429_v41 = vadd.f32 %v428_v36, %v427_v5 }
 0x23f   :  { %v461_v42 = vadd.f32 %v460_v15, %v459_v31 }
 0x240   :  { %v476_v44 = vrot.slane %v475_v38, 2  ;;  %638 = vpush %v415_v39 }
 0x241   :  { %640 = vpush %v429_v41  ;;  %v462_v45 = vrot.slane %v461_v42, 1 }
 0x242   :  { %v477_v46 = vadd.f32 %v476_v44, %v475_v38  ;;  %642 = vpush %v439_v0 }
 0x243   :  { %644 = vpush %v449_v22  ;;  %v463_v47 = vadd.f32 %v462_v45, %v461_v42 }
 0x244   :  { %v478_v51 = vrot.slane %v477_v46, 1 }
 0x245   :  { %646 = vpush %v463_v47 }
 0x246   :  { %v479_v52 = vadd.f32 %v478_v51, %v477_v46 }
 0x248   :  { %648 = vpush %v479_v52 }
 0x249   :  { %650 = vpush %v489_v53 }
 0x24a   :  { %652 = vpush %v499_v54 }
 0x259   :  { %s621_s0 = spop %620 }
 0x25a   :  { %v502_v55 = vstv %s621_s0 }
 0x25b   :  { %v503_v56 = vsel %vm501_vm5, %v502_v55, 0.0  ;;  %vm546_vm5 = vcmp.eq.s32.totalorder %v774_v16, 16 }
 0x261   :  { %s623_s1 = spop %622 }
 0x262   :  { %v505_v57 = vstv %s623_s1  ;;  %s625_s3 = spop %624 }
 0x263   :  { %v506_v58 = vsel %vm504_vm6, %v505_v57, %v503_v56  ;;  %v510_v60 = vstv %s625_s3  ;;  %s627_s12 = spop %626  ;;  %vm549_vm6 = vcmp.eq.s32.totalorder %v774_v16, 17 }
 0x264   :  { %v508_v59 = vsel %vm507_vm7, 0.0, %v506_v58  ;;  %v513_v62 = vstv %s627_s12  ;;  %vm552_vm7 = vcmp.eq.s32.totalorder %v774_v16, 18 }
 0x265   :  { %v511_v61 = vsel %vm509_vm8, %v510_v60, %v508_v59  ;;  %vm555_vm8 = vcmp.eq.s32.totalorder %v774_v16, 19 }
 0x266   :  { %v514_v63 = vsel %vm512_vm9, %v513_v62, %v511_v61 }
 0x269   :  { %s629_s13 = spop %628 }
 0x26a   :  { %v516_v35 = vstv %s629_s13  ;;  %s631_s14 = spop %630 }
 0x26b   :  { %v517_v2 = vsel %vm515_vm10, %v516_v35, %v514_v63  ;;  %s633_s15 = spop %632  ;;  %v521_v4 = vstv %s631_s14 }
 0x26c   :  { %v519_v3 = vsel %vm518_vm11, 1.0, %v517_v2  ;;  %s635_s16 = spop %634  ;;  %v524_v9 = vstv %s633_s15 }
 0x26d   :  { %v522_v8 = vsel %vm520_vm12, %v521_v4, %v519_v3  ;;  %s637_s17 = spop %636  ;;  %v527_v11 = vstv %s635_s16 }
 0x26e   :  { %v525_v10 = vsel %vm523_vm13, %v524_v9, %v522_v8  ;;  %v530_v12 = vstv %s637_s17 }
 0x26f   :  { %v528_v40 = vsel %vm526_vm14, %v527_v11, %v525_v10 }
 0x270   :  { %v531_v13 = vsel %vm529_vm15, %v530_v12, %v528_v40 }
 0x271   :  { %v533_v14 = vsel %vm532_vm0, 0.0, %v531_v13  ;;  %s639_s18 = spop %638 }
 0x272   :  { %v535_v17 = vstv %s639_s18  ;;  %s641_s19 = spop %640 }
 0x273   :  { %v536_v18 = vsel %vm534_vm1, %v535_v17, %v533_v14  ;;  %v538_v19 = vstv %s641_s19  ;;  %s643_s20 = spop %642 }
 0x274   :  { %v539_v21 = vsel %vm537_vm2, %v538_v19, %v536_v18  ;;  %v541_v6 = vstv %s643_s20  ;;  %s645_s21 = spop %644 }
 0x275   :  { %v542_v23 = vsel %vm540_vm3, %v541_v6, %v539_v21  ;;  %v544_v24 = vstv %s645_s21 }
 0x276   :  { %s647_s22 = spop %646  ;;  %v545_v20 = vsel %vm543_vm4, %v544_v24, %v542_v23 }
 0x277   :  { %v547_v25 = vstv %s647_s22 }
 0x278   :  { %v548_v27 = vsel %vm546_vm5, %v547_v25, %v545_v20 }
 0x279   :  { %s649_s26 = spop %648 }
 0x27a   :  { %v550_v28 = vstv %s649_s26  ;;  %s651_s29 = spop %650 }
 0x27b   :  { %v551_v5 = vsel %vm549_vm6, %v550_v28, %v548_v27  ;;  %v553_v29 = vstv %s651_s29  ;;  %s653_s30 = spop %652 }
 0x27c   :  { %v554_v30 = vsel %vm552_vm7, %v553_v29, %v551_v5  ;;  %v556_v31 = vstv %s653_s30 }
 0x27d   :  { %v557_v32 = vsel %vm555_vm8, %v556_v31, %v554_v30 }
 0x27e   :  { %558 = vst [vmem:[#allocation2] sm:$0x1] %v557_v32 }
 0x27f   :  { %569 = dma.vmem_to_hbm [thread:$0]  %s565_s28, 16, %s567_s25, [#allocation3]  }
 0x280   :  { %705 = dma.done.wait [#allocation3], 16  }
 0x281   :  { %706 = vsyncadd [#allocation3], 4294967280 }
 0x282   :  { %574 = vsyncpa [#allocation3], 1 }

// kernel: tpu_custom_call.1
= control target key start
LH: loop header
LB: loop body
LE: loop exit
PB: predicated region body
PF: predicated region fallthrough
CT: control target
= control target key end

     0   :  { %v707_v2 = vmov 0   ;;  %s990_s0 = inlined_call_operand.vmem [shape: bf16[16,128], index: 0, kind: input, shape index: {}]   ;;  %s991_s1 = inlined_call_operand.vmem [shape: bf16[128,16], index: 1, kind: input, shape index: {}]   ;;  %s992_s2 = inlined_call_operand.vmem [shape: s32[16,1], index: 2, kind: input, shape index: {}]   ;;  %s993_s3 = inlined_call_operand.vmem [shape: s32[1,16], index: 3, kind: input, shape index: {}]   ;;  %s994_s4 = inlined_call_operand.hbm [shape: f32[1,1,128], index: 4, kind: output, shape index: {}]  }
   0x1   :  { %v619_v0 = vld [vmem:[%s991_s1 + $0x38] sm:$0xff]  ;;  %v618_v1 = vld [vmem:[%s991_s1 + $0x30] sm:$0xff]  ;;  %658 = vset.pattern.permute.xlu1 %v707_v2  ;;  %v117_v3 = vld [vmem:[%s992_s2] sm:$0xff]  ;;  %659 = vset.pattern.permute.xlu0 %v707_v2 }
   0x2   :  { %90 = vmatpush.bf16.msra.mxu0 %v619_v0  ;;  %121 = vperm.xlu1 %658, %v117_v3  }
   0x3   :  { %9 = vsyncpa [#allocation3], 0  ;;  %v617_v4 = vld [vmem:[%s991_s1 + $0x28] sm:$0xff]  ;;  %v616_v6 = vld [vmem:[%s991_s1 + $0x20] sm:$0xff]  ;;  %v105_v14 = vlaneseq  ;;  %vm708_vm2 = vmmov 1   ;;  %vm133_vm6 = vcmask 130048  }
   0x4   :  { %v118_v5 = vld [vmem:[%s992_s2 + $0x8] sm:$0xff]  ;;  %v615_v7 = vld [vmem:[%s991_s1 + $0x18] sm:$0xff]  ;;  %v614_v8 = vld [vmem:[%s991_s1 + $0x10] sm:$0xff]  ;;  %v709_v19 = vmov 0.0   ;;  %vm290_vm10 = vcmask 7168   ;;  %s566_s25 = sshll.u32 %s994_s4, 4  ;;  %s567_s25 = int_to_ptr.hbm [resolvable:$true] %s566_s25 }
   0x5   :  { %v613_v9 = vld [vmem:[%s991_s1 + $0x8] sm:$0xff]  ;;  %v612_v10 = vld [vmem:[%s991_s1] sm:$0xff]  ;;  %v772_v15 = vshrl.u32 %v105_v14, 7  ;;  %v774_v16 = vand.u32 127, %v105_v14  ;;  %s710_s27 = smov [#allocation2]  }
   0x6   :  { %91 = vmatpush.bf16.msra.mxu0 %v618_v1  ;;  %v611_v11 = vld [vmem:[%s990_s0] sm:$0xff]  ;;  %s564_s28 = sshll.u32 %s710_s27, 4  ;;  %s565_s28 = int_to_ptr.vmem [resolvable:$true] %s564_s28 }
   0x7   :  { %v660_v12 = vld [vmem:[%s993_s3] ss:$0 sm:$0xff]  ;;  %vm113_vm1 = vcmp.eq.s32.totalorder %v774_v16, %v772_v15  ;;  %v779_v17 = vadd.s32 8, %v772_v15 }
   0x8   :  { %vm129_vm3 = vmxor %vm113_vm1, %vm708_vm2 }
   0x9   :  { %vm114_vm5 = vcmp.eq.s32.totalorder %v774_v16, %v779_v17 }
   0xa   :  { %92 = vmatpush.bf16.msra.mxu0 %v617_v4  ;;  %124 = vperm.xlu1 %658, %v118_v5   ;;  %vm130_vm7 = vmxor %vm114_vm5, %vm708_vm2 }
   0xe   :  { %93 = vmatpush.bf16.msra.mxu0 %v616_v6 }
  0x12   :  { %94 = vmatpush.bf16.msra.mxu0 %v615_v7 }
  0x16   :  { %95 = vmatpush.bf16.msra.mxu0 %v614_v8 }
  0x1a   :  { %96 = vmatpush.bf16.msra.mxu0 %v613_v9 }
  0x1e   :  { %97 = vmatpush.bf16.msra.mxu0 %v612_v10 }
  0x21   :  { %98 = vmatmul.bf16.vlgmr.msra.gmra.mxu0 %v611_v11 }
  0x74   :  { %v122_v13 = vpop.permute.xlu1 %121 }
  0x75   :  { %vm127_vm0 = vcmp.eq.s32.totalorder %v122_v13, %v660_v12 }
  0x76   :  { %vm784_vm4 = vmand %vm127_vm0, %vm129_vm3 }
  0x77   :  { %v190_v20 = vsel %vm784_vm4, 1.0, %v709_v19 }
  0x78   :  { %v192_v21 = vsel %vm133_vm6, %v190_v20, 0.0 }
  0x79   :  { %193 = vadd.xlane.f32.xlu2 %v192_v21 }
  0x7c   :  { %v125_v22 = vpop.permute.xlu1 %124 }
  0x7d   :  { %vm128_vm8 = vcmp.eq.s32.totalorder %v125_v22, %v660_v12 }
  0x7e   :  { %vm796_vm9 = vmand %vm128_vm8, %vm130_vm7  ;;  %vm507_vm7 = vcmp.eq.s32.totalorder %v774_v16, 2  ;;  %vm509_vm8 = vcmp.eq.s32.totalorder %v774_v16, 3 }
  0x7f   :  { %v191_v24 = vsel %vm796_vm9, 1.0, %v709_v19 }
  0x80   :  { %v195_v25 = vsel %vm133_vm6, %v191_v24, 0.0 }
  0x81   :  { %196 = vadd.xlane.f32.xlu2 %v195_v25 }
  0x9e   :  { %v99_v26 = vpop.f32.mrf.mxu0 }
  0x9f   :  { %v134_v27 = vsel %vm133_vm6, %v99_v26, -inf }
  0xa0   :  { %135 = vmax.xlane.f32.xlu0 %v134_v27 }
  0xa6   :  { %v101_v28 = vpop.f32.mrf.mxu0 }
  0xa7   :  { %v137_v29 = vsel %vm133_vm6, %v101_v28, -inf }
  0xa8   :  { %138 = vmax.xlane.f32.xlu0 %v137_v29 }
  0xec   :  { %v837_v0 = vpop.xlane.xlu2 %193 }
  0xed   :  { %v842_v4 = vmax.f32 %v837_v0, 1.0  ;;  %vm206_vm3 = vcmp.gt.f32.partialorder %v837_v0, 0.0 }
  0xef   :  { %vm219_vm11 = vweird.f32 %v842_v4 }
  0xf4   :  { %v839_v1 = vpop.xlane.xlu2 %196 }
  0xf5   :  { %v845_v5 = vmax.f32 %v839_v1, 1.0 }
  0xf7   :  { %vm234_vm14 = vweird.f32 %v845_v5 }
 0x113   :  { %v136_v30 = vpop.xlane.xlu0 %135 }
 0x114   :  { %v140_v31 = vsub.f32 %v99_v26, %v136_v30 }
 0x116   :  { %v142_v32 = vmul.f32 1.442695, %v140_v31  ;;  %v246_v41 = vsel %vm133_vm6, %v140_v31, 0.0  ;;  %v252_v45 = vmul.f32 %v140_v31, %v140_v31  ;;  %v198_v53 = vsel %vm784_vm4, %v140_v31, 0.0 }
 0x117   :  { %v200_v55 = vsel %vm133_vm6, %v198_v53, 0.0  ;;  %v260_v58 = vsel %vm133_vm6, %v140_v31, inf  ;;  %v174_v61 = vsel %vm113_vm1, -inf, %v140_v31  ;;  %vm207_vm4 = vcmp.gt.f32.partialorder %v839_v1, 0.0 }
 0x118   :  { %661 = vpow2.f32 %v142_v32  ;;  %v254_v46 = vsel %vm133_vm6, %v252_v45, 0.0  ;;  %v176_v63 = vsel %vm133_vm6, %v174_v61, -inf }
 0x11b   :  { %v139_v33 = vpop.xlane.xlu0 %138 }
 0x11c   :  { %v141_v34 = vsub.f32 %v101_v28, %v139_v33 }
 0x11e   :  { %v662_v35 = vpop.eup %661  ;;  %v144_v36 = vmul.f32 1.442695, %v141_v34  ;;  %v249_v47 = vsel %vm133_vm6, %v141_v34, 0.0  ;;  %v263_v48 = vsel %vm133_vm6, %v141_v34, inf  ;;  %v253_v50 = vmul.f32 %v141_v34, %v141_v34 }
 0x11f   :  { %v154_v37 = vsel %vm133_vm6, %v662_v35, 0.0  ;;  %v146_v38 = vsel %vm113_vm1, %v662_v35, 0.0  ;;  %v160_v49 = vmul.f32 %v662_v35, %v662_v35  ;;  %v199_v57 = vsel %vm796_vm9, %v141_v34, 0.0 }
 0x120   :  { %155 = vadd.xlane.f32.xlu2 %v154_v37  ;;  %v148_v39 = vsel %vm133_vm6, %v146_v38, 0.0  ;;  %663 = vpow2.f32 %v144_v36  ;;  %v257_v52 = vsel %vm133_vm6, %v253_v50, 0.0  ;;  %v203_v59 = vsel %vm133_vm6, %v199_v57, 0.0 }
 0x121   :  { %149 = vadd.xlane.f32.xlu0 %v148_v39  ;;  %v162_v51 = vsel %vm133_vm6, %v160_v49, 0.0  ;;  %v175_v60 = vsel %vm114_vm5, -inf, %v141_v34  ;;  %665 = vrcp.f32 %v842_v4  ;;  %v240_v49 = vand.u32 2147483648, %v845_v5 }
 0x122   :  { %v179_v62 = vsel %vm133_vm6, %v175_v60, -inf  ;;  %667 = vrcp.f32 %v845_v5  ;;  %vm512_vm9 = vcmp.eq.s32.totalorder %v774_v16, 4 }
 0x126   :  { %v664_v40 = vpop.eup %663 }
 0x127   :  { %v157_v42 = vsel %vm133_vm6, %v664_v40, 0.0  ;;  %v147_v43 = vsel %vm114_vm5, %v664_v40, 0.0  ;;  %v161_v54 = vmul.f32 %v664_v40, %v664_v40  ;;  %v856_v14 = vpop.eup %665  ;;  %v225_v40 = vand.u32 2147483648, %v842_v4 }
 0x128   :  { %247 = vadd.xlane.f32.xlu2 %v246_v41  ;;  %v151_v44 = vsel %vm133_vm6, %v147_v43, 0.0  ;;  %v858_v15 = vpop.eup %667  ;;  %v215_v18 = vmul.f32 %v856_v14, %v842_v4  ;;  %vm220_vm12 = vweird.f32 %v856_v14  ;;  %vm501_vm5 = vcmp.eq.s32.totalorder %v774_v16, 0 }
 0x129   :  { %158 = vadd.xlane.f32.xlu0 %v157_v42  ;;  %152 = vadd.xlane.f32.xlu1 %v151_v44  ;;  %v165_v56 = vsel %vm133_vm6, %v161_v54, 0.0  ;;  %v230_v25 = vmul.f32 %v858_v15, %v845_v5  ;;  %vm892_vm13 = vmor %vm219_vm11, %vm220_vm12  ;;  %vm235_vm15 = vweird.f32 %v858_v15  ;;  %vm504_vm6 = vcmp.eq.s32.totalorder %v774_v16, 1 }
 0x12a   :  { %v216_v28 = vsub.f32 1.0, %v215_v18  ;;  %vm929_vm1 = vmor %vm234_vm14, %vm235_vm15  ;;  %vm518_vm11 = vcmp.eq.s32.totalorder %v774_v16, 6  ;;  %vm520_vm12 = vcmp.eq.s32.totalorder %v774_v16, 7  ;;  %vm526_vm14 = vcmp.eq.s32.totalorder %v774_v16, 9 }
 0x12b   :  { %v231_v29 = vsub.f32 1.0, %v230_v25  ;;  %vm529_vm15 = vcmp.eq.s32.totalorder %v774_v16, 10 }
 0x12c   :  { %v217_v32 = vmul.f32 %v856_v14, %v216_v28 }
 0x12d   :  { %v232_v41 = vmul.f32 %v858_v15, %v231_v29 }
 0x12e   :  { %v218_v43 = vadd.f32 %v856_v14, %v217_v32 }
 0x130   :  { %255 = vadd.xlane.f32.xlu2 %v254_v46 }
 0x131   :  { %250 = vadd.xlane.f32.xlu0 %v249_v47  ;;  %264 = vmin.xlane.f32.xlu1 %v263_v48  ;;  %v223_v48 = vand.u32 2147483647, %v842_v4 }
 0x133   :  { %vm912_vm0 = vcmp.eq.f32.partialorder %v223_v48, 8.507059e+37 }
 0x138   :  { %163 = vadd.xlane.f32.xlu2 %v162_v51  ;;  %v226_v51 = vor.u32 1.1754944e-38, %v225_v40 }
 0x139   :  { %258 = vadd.xlane.f32.xlu0 %v257_v52  ;;  %v233_v52 = vadd.f32 %v858_v15, %v232_v41 }
 0x13b   :  { %v237_v28 = vsel %vm929_vm1, %v858_v15, %v233_v52  ;;  %vm534_vm1 = vcmp.eq.s32.totalorder %v774_v16, 12 }
 0x140   :  { %201 = vadd.xlane.f32.xlu2 %v200_v55  ;;  %v222_v55 = vsel %vm892_vm13, %v856_v14, %v218_v43  ;;  %v238_v14 = vand.u32 2147483647, %v845_v5  ;;  %v241_v5 = vor.u32 1.1754944e-38, %v240_v49  ;;  %vm523_vm13 = vcmp.eq.s32.totalorder %v774_v16, 8 }
 0x141   :  { %166 = vadd.xlane.f32.xlu0 %v165_v56 }
 0x142   :  { %vm239_vm2 = vcmp.eq.f32.partialorder %v238_v14, 8.507059e+37 }
 0x143   :  { %v242_v41 = vsel %vm239_vm2, %v241_v5, %v237_v28  ;;  %vm537_vm2 = vcmp.eq.s32.totalorder %v774_v16, 13 }
 0x148   :  { %261 = vmin.xlane.f32.xlu2 %v260_v58 }
 0x149   :  { %204 = vadd.xlane.f32.xlu0 %v203_v59 }
 0x150   :  { %180 = vmax.xlane.f32.xlu2 %v179_v62 }
 0x151   :  { %177 = vmax.xlane.f32.xlu0 %v176_v63 }
 0x193   :  { %v156_v2 = vpop.xlane.xlu2 %155 }
 0x194   :  { %v150_v3 = vpop.xlane.xlu0 %149  ;;  %v329_v10 = vsel %vm290_vm10, %v156_v2, 0.0 }
 0x195   :  { %v847_v6 = vsub.f32 %v156_v2, %v150_v3  ;;  %v170_v50 = vmul.f32 %v150_v3, %v150_v3 }
 0x197   :  { %669 = vlog2.f32 %v847_v6  ;;  %v367_v3 = vsel %vm290_vm10, %v847_v6, 0.0 }
 0x19b   :  { %v851_v7 = vpop.xlane.xlu2 %247 }
 0x19c   :  { %v153_v8 = vpop.xlane.xlu1 %152  ;;  %v159_v9 = vpop.xlane.xlu0 %158  ;;  %v291_v23 = vsel %vm290_vm10, %v851_v7, 0.0 }
 0x19d   :  { %v169_v11 = vsub.f32 %v159_v9, %v153_v8  ;;  %v330_v12 = vsel %vm290_vm10, %v159_v9, 0.0  ;;  %v670_v17 = vpop.eup %669  ;;  %v171_v54 = vmul.f32 %v153_v8, %v153_v8 }
 0x19e   :  { %v331_v13 = vadd.f32 %v330_v12, %v329_v10  ;;  %v866_v22 = vmul.f32 0.6931472, %v670_v17 }
 0x19f   :  { %671 = vlog2.f32 %v169_v11  ;;  %v368_v60 = vsel %vm290_vm10, %v169_v11, 0.0 }
 0x1a0   :  { %332 = vadd.xlane.f32.xlu2 %v331_v13  ;;  %v284_v30 = vsub.f32 0.0, %v866_v22  ;;  %v274_v36 = vmul.f32 2.0, %v866_v22  ;;  %v270_v53 = vmul.f32 16.0, %v866_v22  ;;  %v208_v59 = vmul.f32 %v837_v0, %v866_v22 }
 0x1a1   :  { %v369_v12 = vadd.f32 %v368_v60, %v367_v3 }
 0x1a2   :  { %v276_v46 = vmul.f32 %v274_v36, %v851_v7  ;;  %v280_v11 = vmul.f32 %v270_v53, %v866_v22 }
 0x1a3   :  { %v862_v19 = vpop.xlane.xlu2 %255 }
 0x1a4   :  { %v864_v20 = vpop.xlane.xlu0 %250  ;;  %v305_v38 = vsel %vm290_vm10, %v862_v19, 0.0  ;;  %v278_v61 = vsub.f32 %v862_v19, %v276_v46  ;;  %v265_v29 = vpop.xlane.xlu1 %264 }
 0x1a5   :  { %v672_v21 = vpop.eup %671  ;;  %v292_v24 = vsel %vm290_vm10, %v864_v20, 0.0 }
 0x1a6   :  { %v874_v26 = vmul.f32 0.6931472, %v672_v21  ;;  %v293_v27 = vadd.f32 %v292_v24, %v291_v23  ;;  %v227_v23 = vsel %vm912_vm0, %v226_v51, %v222_v55  ;;  %v282_v25 = vadd.f32 %v280_v11, %v278_v61 }
 0x1a7   :  { %vm532_vm0 = vcmp.eq.s32.totalorder %v774_v16, 11 }
 0x1a8   :  { %294 = vadd.xlane.f32.xlu1 %v293_v27  ;;  %v285_v31 = vsub.f32 0.0, %v874_v26  ;;  %v275_v33 = vmul.f32 2.0, %v874_v26  ;;  %v271_v47 = vmul.f32 16.0, %v874_v26 }
 0x1aa   :  { %v880_v35 = vmax.f32 %v284_v30, %v285_v31  ;;  %v277_v44 = vmul.f32 %v275_v33, %v864_v20  ;;  %v281_v62 = vmul.f32 %v271_v47, %v874_v26  ;;  %v273_v17 = vsub.f32 %v864_v20, %v271_v47 }
 0x1ab   :  { %v164_v34 = vpop.xlane.xlu2 %163  ;;  %v272_v20 = vsub.f32 %v851_v7, %v270_v53  ;;  %v209_v31 = vmul.f32 %v839_v1, %v874_v26  ;;  %v287_v7 = vsub.f32 %v265_v29, %v874_v26  ;;  %v268_v53 = vmul.f32 1.442695, %v265_v29 }
 0x1ac   :  { %v259_v37 = vpop.xlane.xlu0 %258  ;;  %v172_v56 = vsub.f32 %v164_v34, %v170_v50  ;;  %v343_v4 = vsel %vm290_vm10, %v164_v34, 0.0  ;;  %v406_v33 = vsel %vm290_vm10, %v273_v17, 0.0 }
 0x1ad   :  { %v306_v39 = vsel %vm290_vm10, %v259_v37, 0.0  ;;  %v279_v57 = vsub.f32 %v259_v37, %v277_v44  ;;  %673 = vpow2.f32 %v268_v53 }
 0x1ae   :  { %v307_v42 = vadd.f32 %v306_v39, %v305_v38  ;;  %v381_v19 = vsel %vm290_vm10, %v172_v56, 0.0  ;;  %v419_v38 = vsel %vm290_vm10, %v282_v25, 0.0  ;;  %v405_v39 = vsel %vm290_vm10, %v272_v20, 0.0 }
 0x1af   :  { %v283_v18 = vadd.f32 %v281_v62, %v279_v57  ;;  %v407_v43 = vadd.f32 %v406_v33, %v405_v39 }
 0x1b0   :  { %308 = vadd.xlane.f32.xlu0 %v307_v42 }
 0x1b1   :  { %v420_v32 = vsel %vm290_vm10, %v283_v18, 0.0 }
 0x1b2   :  { %v421_v42 = vadd.f32 %v420_v32, %v419_v38 }
 0x1b3   :  { %v202_v58 = vpop.xlane.xlu2 %201  ;;  %v674_v60 = vpop.eup %673 }
 0x1b4   :  { %v167_v2 = vpop.xlane.xlu0 %166  ;;  %v210_v8 = vsub.f32 %v202_v58, %v208_v59 }
 0x1b5   :  { %v173_v9 = vsub.f32 %v167_v2, %v171_v54  ;;  %v344_v10 = vsel %vm290_vm10, %v167_v2, 0.0 }
 0x1b6   :  { %v345_v13 = vadd.f32 %v344_v10, %v343_v4  ;;  %v228_v27 = vmul.f32 %v227_v23, %v210_v8 }
 0x1b7   :  { %v382_v21 = vsel %vm290_vm10, %v173_v9, 0.0 }
 0x1b8   :  { %370 = vadd.xlane.f32.xlu0 %v369_v12  ;;  %346 = vadd.xlane.f32.xlu1 %v345_v13  ;;  %v383_v24 = vadd.f32 %v382_v21, %v381_v19  ;;  %v244_v37 = vsel %vm206_vm3, %v228_v27, 0.0  ;;  %vm540_vm3 = vcmp.eq.s32.totalorder %v774_v16, 14 }
 0x1b9   :  { %v465_v0 = vmul.f32 %v244_v37, %v244_v37 }
 0x1ba   :  { %384 = vadd.xlane.f32.xlu2 %v383_v24 }
 0x1bb   :  { %v262_v30 = vpop.xlane.xlu2 %261  ;;  %v469_v50 = vsel %vm290_vm10, %v465_v0, 0.0 }
 0x1bc   :  { %v286_v34 = vsub.f32 %v262_v30, %v866_v22  ;;  %v205_v36 = vpop.xlane.xlu0 %204  ;;  %v453_v22 = vsel %vm290_vm10, %v244_v37, 0.0  ;;  %v266_v55 = vmul.f32 1.442695, %v262_v30  ;;  %v319_v58 = vmin.f32 %v262_v30, %v265_v29 }
 0x1bd   :  { %v211_v15 = vsub.f32 %v205_v36, %v209_v31 }
 0x1be   :  { %v948_v40 = vmin.f32 %v286_v34, %v287_v7  ;;  %675 = vpow2.f32 %v266_v55  ;;  %v320_v61 = vrot.slane %v319_v58, 4 }
 0x1bf   :  { %v243_v44 = vmul.f32 %v242_v41, %v211_v15 }
 0x1c0   :  { %422 = vadd.xlane.f32.xlu0 %v421_v42  ;;  %408 = vadd.xlane.f32.xlu1 %v407_v43  ;;  %v321_v10 = vmin.f32 %v319_v58, %v320_v61 }
 0x1c1   :  { %v245_v26 = vsel %vm207_vm4, %v243_v44, 0.0  ;;  %v444_v44 = vrot.slane %v948_v40, 4  ;;  %vm543_vm4 = vcmp.eq.s32.totalorder %v774_v16, 15 }
 0x1c2   :  { %v454_v45 = vsel %vm290_vm10, %v245_v26, 0.0  ;;  %v466_v46 = vmul.f32 %v245_v26, %v245_v26  ;;  %v953_v48 = vmax.f32 %v244_v37, %v245_v26  ;;  %v955_v49 = vmin.f32 %v244_v37, %v245_v26 }
 0x1c3   :  { %v455_v47 = vadd.f32 %v454_v45, %v453_v22  ;;  %v181_v52 = vpop.xlane.xlu2 %180  ;;  %v322_v19 = vrot.slane %v321_v10, 2  ;;  %v434_v37 = vrot.slane %v880_v35, 4  ;;  %v445_v55 = vmin.f32 %v948_v40, %v444_v44 }
 0x1c4   :  { %v470_v51 = vsel %vm290_vm10, %v466_v46, 0.0  ;;  %v178_v54 = vpop.xlane.xlu0 %177  ;;  %v184_v56 = vmul.f32 1.442695, %v181_v52  ;;  %v676_v63 = vpop.eup %675  ;;  %vm515_vm10 = vcmp.eq.s32.totalorder %v774_v16, 5 }
 0x1c5   :  { %456 = vadd.xlane.f32.xlu2 %v455_v47  ;;  %v471_v1 = vadd.f32 %v470_v51, %v469_v50  ;;  %v182_v57 = vmul.f32 1.442695, %v178_v54  ;;  %v357_v11 = vmin.f32 %v676_v63, %v674_v60  ;;  %v323_v28 = vmin.f32 %v321_v10, %v322_v19 }
 0x1c6   :  { %677 = vpow2.f32 %v184_v56  ;;  %v435_v50 = vmax.f32 %v880_v35, %v434_v37  ;;  %v484_v63 = vrot.slane %v953_v48, 4  ;;  %v494_v35 = vrot.slane %v955_v49, 4 }
 0x1c7   :  { %679 = vpow2.f32 %v182_v57  ;;  %v358_v21 = vrot.slane %v357_v11, 4  ;;  %v324_v34 = vrot.slane %v323_v28, 1 }
 0x1c8   :  { %472 = vadd.xlane.f32.xlu1 %v471_v1 }
 0x1c9   :  { %v359_v5 = vmin.f32 %v357_v11, %v358_v21  ;;  %v325_v46 = vmin.f32 %v323_v28, %v324_v34  ;;  %v446_v11 = vrot.slane %v445_v55, 2  ;;  %v485_v21 = vmax.f32 %v953_v48, %v484_v63 }
 0x1cb   :  { %v360_v36 = vrot.slane %v359_v5, 2  ;;  %v447_v28 = vmin.f32 %v445_v55, %v446_v11 }
 0x1cc   :  { %v678_v4 = vpop.eup %677 }
 0x1cd   :  { %v680_v8 = vpop.eup %679  ;;  %v361_v47 = vmin.f32 %v359_v5, %v360_v36 }
 0x1ce   :  { %v395_v14 = vmax.f32 %v680_v8, %v678_v4 }
 0x1cf   :  { %v362_v61 = vrot.slane %v361_v47, 1 }
 0x1d0   :  { %v396_v20 = vrot.slane %v395_v14, 4 }
 0x1d2   :  { %v397_v31 = vmax.f32 %v395_v14, %v396_v20  ;;  %v495_v20 = vmin.f32 %v955_v49, %v494_v35  ;;  %v448_v49 = vrot.slane %v447_v28, 1 }
 0x1d4   :  { %v398_v43 = vrot.slane %v397_v31, 2  ;;  %v496_v37 = vrot.slane %v495_v20, 2 }
 0x1d6   :  { %v399_v54 = vmax.f32 %v397_v31, %v398_v43 }
 0x1d8   :  { %v400_v10 = vrot.slane %v399_v54, 1 }
 0x213   :  { %v333_v59 = vpop.xlane.xlu2 %332 }
 0x214   :  { %v334_v2 = vrot.slane %v333_v59, 4 }
 0x216   :  { %v335_v12 = vadd.f32 %v334_v2, %v333_v59 }
 0x218   :  { %v336_v6 = vrot.slane %v335_v12, 2 }
 0x21a   :  { %v337_v30 = vadd.f32 %v336_v6, %v335_v12 }
 0x21b   :  { %v295_v62 = vpop.xlane.xlu1 %294 }
 0x21c   :  { %v296_v3 = vrot.slane %v295_v62, 4  ;;  %v338_v41 = vrot.slane %v337_v30, 1 }
 0x21e   :  { %v297_v9 = vadd.f32 %v296_v3, %v295_v62  ;;  %v339_v53 = vadd.f32 %v338_v41, %v337_v30  ;;  %v436_v62 = vrot.slane %v435_v50, 2 }
 0x220   :  { %v298_v13 = vrot.slane %v297_v9, 2  ;;  %v437_v19 = vmax.f32 %v435_v50, %v436_v62 }
 0x222   :  { %v299_v17 = vadd.f32 %v298_v13, %v297_v9 }
 0x223   :  { %v309_v18 = vpop.xlane.xlu0 %308 }
 0x224   :  { %v310_v23 = vrot.slane %v309_v18, 4  ;;  %v300_v24 = vrot.slane %v299_v17, 1 }
 0x226   :  { %v311_v25 = vadd.f32 %v310_v23, %v309_v18  ;;  %v301_v27 = vadd.f32 %v300_v24, %v299_v17  ;;  %v363_v17 = vmin.f32 %v361_v47, %v362_v61 }
 0x228   :  { %v312_v29 = vrot.slane %v311_v25, 2  ;;  %620 = vpush %v301_v27 }
 0x22a   :  { %v313_v32 = vadd.f32 %v312_v29, %v311_v25  ;;  %v401_v29 = vmax.f32 %v399_v54, %v400_v10 }
 0x22b   :  { %v347_v33 = vpop.xlane.xlu1 %346  ;;  %v371_v7 = vpop.xlane.xlu0 %370 }
 0x22c   :  { %v348_v15 = vrot.slane %v347_v33, 4  ;;  %v372_v38 = vrot.slane %v371_v7, 4  ;;  %v314_v39 = vrot.slane %v313_v32, 1 }
 0x22d   :  { %v385_v42 = vpop.xlane.xlu2 %384 }
 0x22e   :  { %v349_v0 = vadd.f32 %v348_v15, %v347_v33  ;;  %v373_v26 = vadd.f32 %v372_v38, %v371_v7  ;;  %v386_v22 = vrot.slane %v385_v42, 4  ;;  %v315_v45 = vadd.f32 %v314_v39, %v313_v32 }
 0x22f   :  { %v438_v33 = vrot.slane %v437_v19, 1  ;;  %v486_v7 = vrot.slane %v485_v21, 2 }
 0x230   :  { %v350_v51 = vrot.slane %v349_v0, 2  ;;  %v374_v1 = vrot.slane %v373_v26, 2  ;;  %v387_v52 = vadd.f32 %v386_v22, %v385_v42  ;;  %622 = vpush %v315_v45  ;;  %v449_v22 = vmin.f32 %v447_v28, %v448_v49 }
 0x231   :  { %624 = vpush %v325_v46  ;;  %v487_v43 = vmax.f32 %v485_v21, %v486_v7 }
 0x232   :  { %v388_v56 = vrot.slane %v387_v52, 2  ;;  %626 = vpush %v339_v53  ;;  %v351_v57 = vadd.f32 %v350_v51, %v349_v0  ;;  %v375_v58 = vadd.f32 %v374_v1, %v373_v26  ;;  %v439_v0 = vmax.f32 %v437_v19, %v438_v33 }
 0x233   :  { %v409_v59 = vpop.xlane.xlu1 %408  ;;  %v423_v60 = vpop.xlane.xlu0 %422  ;;  %v497_v26 = vmin.f32 %v495_v20, %v496_v37  ;;  %v488_v50 = vrot.slane %v487_v43, 1 }
 0x234   :  { %v410_v2 = vrot.slane %v409_v59, 4  ;;  %v424_v3 = vrot.slane %v423_v60, 4  ;;  %v352_v4 = vrot.slane %v351_v57, 1  ;;  %v376_v8 = vrot.slane %v375_v58, 1 }
 0x235   :  { %v389_v9 = vadd.f32 %v388_v56, %v387_v52  ;;  %v498_v1 = vrot.slane %v497_v26, 1  ;;  %v489_v53 = vmax.f32 %v487_v43, %v488_v50 }
 0x236   :  { %v411_v40 = vadd.f32 %v410_v2, %v409_v59  ;;  %v425_v12 = vadd.f32 %v424_v3, %v423_v60  ;;  %v353_v13 = vadd.f32 %v352_v4, %v351_v57  ;;  %v377_v14 = vadd.f32 %v376_v8, %v375_v58 }
 0x237   :  { %v390_v18 = vrot.slane %v389_v9, 1  ;;  %v499_v54 = vmin.f32 %v497_v26, %v498_v1 }
 0x238   :  { %v412_v6 = vrot.slane %v411_v40, 2  ;;  %v426_v23 = vrot.slane %v425_v12, 2  ;;  %v457_v24 = vpop.xlane.xlu2 %456  ;;  %628 = vpush %v353_v13 }
 0x239   :  { %v458_v25 = vrot.slane %v457_v24, 4  ;;  %630 = vpush %v363_v17  ;;  %v391_v27 = vadd.f32 %v390_v18, %v389_v9 }
 0x23a   :  { %v427_v5 = vadd.f32 %v426_v23, %v425_v12  ;;  %632 = vpush %v377_v14  ;;  %v413_v30 = vadd.f32 %v412_v6, %v411_v40 }
 0x23b   :  { %v459_v31 = vadd.f32 %v458_v25, %v457_v24  ;;  %634 = vpush %v391_v27  ;;  %v473_v32 = vpop.xlane.xlu1 %472 }
 0x23c   :  { %636 = vpush %v401_v29  ;;  %v474_v48 = vrot.slane %v473_v32, 4  ;;  %v414_v34 = vrot.slane %v413_v30, 1  ;;  %v428_v36 = vrot.slane %v427_v5, 1 }
 0x23d   :  { %v460_v15 = vrot.slane %v459_v31, 2 }
 0x23e   :  { %v475_v38 = vadd.f32 %v474_v48, %v473_v32  ;;  %v415_v39 = vadd.f32 %v414_v34, %v413_v30  ;;  %v429_v41 = vadd.f32 %v428_v36, %v427_v5 }
 0x23f   :  { %v461_v42 = vadd.f32 %v460_v15, %v459_v31 }
 0x240   :  { %v476_v44 = vrot.slane %v475_v38, 2  ;;  %638 = vpush %v415_v39 }
 0x241   :  { %640 = vpush %v429_v41  ;;  %v462_v45 = vrot.slane %v461_v42, 1 }
 0x242   :  { %v477_v46 = vadd.f32 %v476_v44, %v475_v38  ;;  %642 = vpush %v439_v0 }
 0x243   :  { %644 = vpush %v449_v22  ;;  %v463_v47 = vadd.f32 %v462_v45, %v461_v42 }
 0x244   :  { %v478_v51 = vrot.slane %v477_v46, 1 }
 0x245   :  { %646 = vpush %v463_v47 }
 0x246   :  { %v479_v52 = vadd.f32 %v478_v51, %v477_v46 }
 0x248   :  { %648 = vpush %v479_v52 }
 0x249   :  { %650 = vpush %v489_v53 }
 0x24a   :  { %652 = vpush %v499_v54 }
 0x259   :  { %s621_s0 = spop %620 }
 0x25a   :  { %v502_v55 = vstv %s621_s0 }
 0x25b   :  { %v503_v56 = vsel %vm501_vm5, %v502_v55, 0.0  ;;  %vm546_vm5 = vcmp.eq.s32.totalorder %v774_v16, 16 }
 0x261   :  { %s623_s1 = spop %622 }
 0x262   :  { %v505_v57 = vstv %s623_s1  ;;  %s625_s3 = spop %624 }
 0x263   :  { %v506_v58 = vsel %vm504_vm6, %v505_v57, %v503_v56  ;;  %v510_v60 = vstv %s625_s3  ;;  %s627_s12 = spop %626  ;;  %vm549_vm6 = vcmp.eq.s32.totalorder %v774_v16, 17 }
 0x264   :  { %v508_v59 = vsel %vm507_vm7, 0.0, %v506_v58  ;;  %v513_v62 = vstv %s627_s12  ;;  %vm552_vm7 = vcmp.eq.s32.totalorder %v774_v16, 18 }
 0x265   :  { %v511_v61 = vsel %vm509_vm8, %v510_v60, %v508_v59  ;;  %vm555_vm8 = vcmp.eq.s32.totalorder %v774_v16, 19 }
 0x266   :  { %v514_v63 = vsel %vm512_vm9, %v513_v62, %v511_v61 }
 0x269   :  { %s629_s13 = spop %628 }
 0x26a   :  { %v516_v35 = vstv %s629_s13  ;;  %s631_s14 = spop %630 }
 0x26b   :  { %v517_v2 = vsel %vm515_vm10, %v516_v35, %v514_v63  ;;  %s633_s15 = spop %632  ;;  %v521_v4 = vstv %s631_s14 }
 0x26c   :  { %v519_v3 = vsel %vm518_vm11, 1.0, %v517_v2  ;;  %s635_s16 = spop %634  ;;  %v524_v9 = vstv %s633_s15 }
 0x26d   :  { %v522_v8 = vsel %vm520_vm12, %v521_v4, %v519_v3  ;;  %s637_s17 = spop %636  ;;  %v527_v11 = vstv %s635_s16 }
 0x26e   :  { %v525_v10 = vsel %vm523_vm13, %v524_v9, %v522_v8  ;;  %v530_v12 = vstv %s637_s17 }
 0x26f   :  { %v528_v40 = vsel %vm526_vm14, %v527_v11, %v525_v10 }
 0x270   :  { %v531_v13 = vsel %vm529_vm15, %v530_v12, %v528_v40 }
 0x271   :  { %v533_v14 = vsel %vm532_vm0, 0.0, %v531_v13  ;;  %s639_s18 = spop %638 }
 0x272   :  { %v535_v17 = vstv %s639_s18  ;;  %s641_s19 = spop %640 }
 0x273   :  { %v536_v18 = vsel %vm534_vm1, %v535_v17, %v533_v14  ;;  %v538_v19 = vstv %s641_s19  ;;  %s643_s20 = spop %642 }
 0x274   :  { %v539_v21 = vsel %vm537_vm2, %v538_v19, %v536_v18  ;;  %v541_v6 = vstv %s643_s20  ;;  %s645_s21 = spop %644 }
 0x275   :  { %v542_v23 = vsel %vm540_vm3, %v541_v6, %v539_v21  ;;  %v544_v24 = vstv %s645_s21 }
 0x276   :  { %s647_s22 = spop %646  ;;  %v545_v20 = vsel %vm543_vm4, %v544_v24, %v542_v23 }
 0x277   :  { %v547_v25 = vstv %s647_s22 }
 0x278   :  { %v548_v27 = vsel %vm546_vm5, %v547_v25, %v545_v20 }
 0x279   :  { %s649_s26 = spop %648 }
 0x27a   :  { %v550_v28 = vstv %s649_s26  ;;  %s651_s29 = spop %650 }
 0x27b   :  { %v551_v5 = vsel %vm549_vm6, %v550_v28, %v548_v27  ;;  %v553_v29 = vstv %s651_s29  ;;  %s653_s30 = spop %652 }
 0x27c   :  { %v554_v30 = vsel %vm552_vm7, %v553_v29, %v551_v5  ;;  %v556_v31 = vstv %s653_s30 }
 0x27d   :  { %v557_v32 = vsel %vm555_vm8, %v556_v31, %v554_v30 }
 0x27e   :  { %558 = vst [vmem:[#allocation2] sm:$0x1] %v557_v32 }
 0x27f   :  { %569 = dma.vmem_to_hbm [thread:$0]  %s565_s28, 16, %s567_s25, [#allocation3]  }
 0x280   :  { %705 = dma.done.wait [#allocation3], 16  }
 0x281   :  { %706 = vsyncadd [#allocation3], 4294967280 }
 0x282   :  { %574 = vsyncpa [#allocation3], 1 }

</bundles_post_ra>
